<compile_context>
chip_gen: v7x
topology: tpu7x:2x2x1
jax: 0.10.0
libtpu: 0.0.40
codegen_flags: <defaults>
</compile_context>

<pallas_src>
import functools
import math

import jax
import jax.numpy as jnp
from jax.experimental import pallas as pl
from jax.experimental.pallas import tpu as pltpu

# Small synthetic config standing in for SpanBERT-base (768 hidden, 12 layers).
VOCAB = 128
MAX_POS = 64
HIDDEN = 32
NUM_HEADS = 4
HEAD_DIM = HIDDEN // NUM_HEADS
INTERMEDIATE = 64
NUM_LAYERS = 2
NUM_LABELS = 5
LANE = 128                     # classifier logits padded to one full lane group
LN_EPS = 1e-12
_IGNORE_INDEX = -100


# ----------------------------- in-kernel helpers (f32 math) -----------------------------

def _layernorm(y, g, b):
    mu = jnp.mean(y, axis=-1, keepdims=True)
    var = jnp.mean((y - mu) ** 2, axis=-1, keepdims=True)
    return (y - mu) * jax.lax.rsqrt(var + LN_EPS) * g + b


def _erf(x):
    # Abramowitz & Stegun 7.1.26 polynomial approximation of erf (|err| < 1.5e-7)
    # so we get HF's erf-based "gelu" without relying on a lax.erf lowering.
    # The division is done with an EUP approx reciprocal (frees VALU slots).
    # TODO(synk): on v5e prefer the tanh-form GELU if bit-exact HF erf isn't needed.
    p = 0.3275911
    a1, a2, a3, a4, a5 = (0.254829592, -0.284496736, 1.421413741,
                          -1.453152027, 1.061405429)
    sgn = jnp.where(x >= 0.0, 1.0, -1.0)
    ax = jnp.abs(x)
    t = pl.reciprocal(1.0 + p * ax, approx=True)
    poly = ((((a5 * t + a4) * t + a3) * t + a2) * t + a1) * t
    return sgn * (1.0 - poly * jnp.exp(-ax * ax))


def _gelu(y):
    return 0.5 * y * (1.0 + _erf(y * (1.0 / math.sqrt(2.0))))


def _mm(a, w_bf16, bias_f32):
    # bf16 MXU matmul with f32 accumulation; bias add in f32.
    return jnp.dot(a.astype(jnp.bfloat16), w_bf16,
                   preferred_element_type=jnp.float32) + bias_f32


def _const_spec(w):
    # Grid-invariant block (constant index_map): single-buffer it so weight VMEM
    # is not doubled.  Falls back to the default spec on older jax versions.
    idx = lambda i, _nd=w.ndim: (0,) * _nd
    try:
        return pl.BlockSpec(w.shape, idx, pipeline_mode=pl.Buffered(1))
    except (AttributeError, TypeError):
        return pl.BlockSpec(w.shape, idx)


# ----------------------------- Pallas kernels -----------------------------

def _embed_ln_kernel(ids_ref, wemb_ref, pos_ref, type_ref, g_ref, b_ref, o_ref):
    # Fused word-embedding gather (one-hot matmul), word+pos+token-type add and
    # embedding LayerNorm.  token_type_ids defaults to 0 (HF behaviour when none
    # are passed to the model).
    ids = ids_ref[0]                                            # (S, 1) int32
    seq = ids.shape[0]
    vocab = wemb_ref.shape[0]
    onehot = (jax.lax.broadcasted_iota(jnp.int32, (seq, vocab), 1)
              == ids).astype(jnp.float32)
    # TODO(synk): at a real ~29k-token vocab replace the one-hot matmul with a
    # DMA row-gather / scalar-prefetch index_map.
    we = jnp.dot(onehot, wemb_ref[...], preferred_element_type=jnp.float32)
    y = we + pos_ref[...] + type_ref[...]
    o_ref[0] = _layernorm(y, g_ref[...], b_ref[...]).astype(o_ref.dtype)


def _encoder_layer_kernel(x_ref, bias_ref, wqkv_ref, bqkv_ref, wo_ref, bo_ref,
                          ln1g_ref, ln1b_ref, w1_ref, b1_ref, w2_ref, b2_ref,
                          ln2g_ref, ln2b_ref, o_ref, *, num_heads, head_dim):
    x_bf = x_ref[0]                                  # (S, H) bf16 residual stream
    x = x_bf.astype(jnp.float32)                     # f32 for residual/LN math
    seq, h_dim = x.shape
    bias = bias_ref[...]                             # (1, 1, S) padding-mask bias

    # --- head-major fused QKV projection: one batched einsum, one bf16 cast ---
    xh = jnp.broadcast_to(x_bf, (num_heads, seq, h_dim))
    qkv = jnp.einsum("hsd,hdf->hsf", xh, wqkv_ref[...],
                     preferred_element_type=jnp.float32) + bqkv_ref[...]
    qkv = qkv.astype(jnp.bfloat16)                   # (nh, S, 3*dh), single cast
    q = qkv[..., :head_dim]                          # 1/sqrt(dh) folded into wqkv
    k = qkv[..., head_dim:2 * head_dim]
    v = qkv[..., 2 * head_dim:]

    # --- batched multi-head self-attention; softmax in f32, no HBM round-trips ---
    s = jnp.einsum("hqd,hkd->hqk", q, k,
                   preferred_element_type=jnp.float32) + bias    # (nh, S, S)
    s = s - jnp.max(s, axis=-1, keepdims=True)
    e = jnp.exp(s)
    p = e * pl.reciprocal(jnp.sum(e, axis=-1, keepdims=True), approx=True)
    # (attention-prob dropout 0.3 is identity in eval mode)
    ctx = jnp.einsum("hqk,hkd->hqd", p.astype(jnp.bfloat16), v,
                     preferred_element_type=jnp.float32)         # (nh, S, dh)

    # --- per-head output projection + head-sum + residual + LayerNorm ---
    attn = jnp.einsum("hsd,hdk->hsk", ctx.astype(jnp.bfloat16), wo_ref[...],
                      preferred_element_type=jnp.float32)        # (nh, S, H)
    attn_out = jnp.sum(attn, axis=0) + bo_ref[...]
    x1 = _layernorm(attn_out + x, ln1g_ref[...], ln1b_ref[...])

    # --- FFN (erf-gelu) + residual + LayerNorm ---
    ffn = _mm(_gelu(_mm(x1, w1_ref[...], b1_ref[...])), w2_ref[...], b2_ref[...])
    o_ref[0] = _layernorm(ffn + x1, ln2g_ref[...], ln2b_ref[...]).astype(o_ref.dtype)


def _classifier_ce_kernel(x_ref, w_ref, b_ref, labels_ref, mask_ref,
                          logits_ref, loss_ref, acc_ref):
    # Classifier matmul fused with the masked cross-entropy, row-tiled over the
    # grid.  Logits are lane-padded to 128 columns (dense stores, full MXU
    # columns); only the first NUM_LABELS columns are meaningful.
    step = pl.program_id(0)

    @pl.when(step == 0)
    def _():
        acc_ref[0] = jnp.float32(0.0)        # running sum of nll * valid
        acc_ref[1] = jnp.float32(0.0)        # running sum of valid

    logits = _mm(x_ref[...], w_ref[...], b_ref[...])             # (tn, 128) f32
    logits_ref[...] = logits.astype(logits_ref.dtype)

    tn, c_pad = logits.shape
    cls = jax.lax.broadcasted_iota(jnp.int32, (tn, c_pad), 1)
    class_ok = cls < NUM_LABELS
    lg = jnp.where(class_ok, logits, -1e30)                      # mask pad classes
    lmax = jnp.max(lg, axis=-1, keepdims=True)
    ex = jnp.where(class_ok, jnp.exp(lg - lmax), 0.0)
    logz = jnp.log(jnp.sum(ex, axis=-1, keepdims=True)) + lmax

    labels = labels_ref[...]                                     # (tn, 1) int32
    # CrossEntropyLoss(ignore_index=-100) on torch.where(attention_mask==1, labels, -100):
    # a position counts only if it is attended AND its label is not ignore_index.
    valid = jnp.logical_and(mask_ref[...] > 0.5,
                            labels != _IGNORE_INDEX).astype(jnp.float32)
    picked = jnp.sum(jnp.where(cls == labels, logits, 0.0), axis=-1, keepdims=True)
    nll = logz - picked                                          # (tn, 1)

    acc_ref[0] = acc_ref[0] + jnp.sum(nll * valid)
    acc_ref[1] = acc_ref[1] + jnp.sum(valid)

    @pl.when(step == pl.num_programs(0) - 1)
    def _():
        # NOTE: NaN if the batch has no valid token, matching torch CrossEntropyLoss.
        loss_ref[0, 0] = acc_ref[0] / acc_ref[1]


def _classifier_kernel(x_ref, w_ref, b_ref, o_ref):
    o_ref[...] = _mm(x_ref[...], w_ref[...], b_ref[...]).astype(o_ref.dtype)


# ----------------------------- kernel wrappers -----------------------------

def embed_layernorm(input_ids, word_emb, pos, type0, g, b):
    B, S = input_ids.shape
    H = word_emb.shape[1]
    ids3 = input_ids.reshape(B, S, 1).astype(jnp.int32)
    return pl.pallas_call(
        _embed_ln_kernel,
        out_shape=jax.ShapeDtypeStruct((B, S, H), jnp.bfloat16),
        grid=(B,),
        in_specs=[pl.BlockSpec((1, S, 1), lambda i: (i, 0, 0)),
                  _const_spec(word_emb), _const_spec(pos), _const_spec(type0),
                  _const_spec(g), _const_spec(b)],
        out_specs=pl.BlockSpec((1, S, H), lambda i: (i, 0, 0)),
        compiler_params=pltpu.CompilerParams(dimension_semantics=("parallel",)),
    )(ids3, word_emb, pos, type0, g, b)


def encoder_layer(x, mask_bias, lp):
    B, S, H = x.shape
    weights = (lp["wqkv"], lp["bqkv"], lp["wo"], lp["bo"],
               lp["ln1_g"], lp["ln1_b"], lp["w1"], lp["b1"],
               lp["w2"], lp["b2"], lp["ln2_g"], lp["ln2_b"])
    kern = functools.partial(_encoder_layer_kernel,
                             num_heads=NUM_HEADS, head_dim=HEAD_DIM)
    flops = 2 * B * S * H * (4 * H + 2 * INTERMEDIATE) + 4 * B * S * S * H
    w_bytes = sum(int(w.size) * w.dtype.itemsize for w in weights)
    return pl.pallas_call(
        kern,
        out_shape=jax.ShapeDtypeStruct((B, S, H), jnp.bfloat16),
        grid=(B,),
        in_specs=[pl.BlockSpec((1, S, H), lambda b: (b, 0, 0)),
                  pl.BlockSpec((1, 1, S), lambda b: (b, 0, 0))]
                 + [_const_spec(w) for w in weights],
        out_specs=pl.BlockSpec((1, S, H), lambda b: (b, 0, 0)),
        compiler_params=pltpu.CompilerParams(dimension_semantics=("parallel",)),
        cost_estimate=pl.CostEstimate(
            flops=flops,
            transcendentals=B * (NUM_HEADS * S * S + S * INTERMEDIATE),
            bytes_accessed=2 * (2 * B * S * H) + 4 * B * S + w_bytes),
    )(x, mask_bias, *weights)


def classifier_with_loss(x2d, w, b, labels2d, mask2d):
    n, h = x2d.shape
    c_pad = w.shape[1]
    # TODO(synk): at real shapes (B*S ~ 4k-16k rows) use ~512-row tiles.
    tn = 8 if n % 8 == 0 else n
    logits_pad, loss = pl.pallas_call(
        _classifier_ce_kernel,
        out_shape=(jax.ShapeDtypeStruct((n, c_pad), jnp.float32),
                   jax.ShapeDtypeStruct((1, 1), jnp.float32)),
        grid=(n // tn,),
        in_specs=[pl.BlockSpec((tn, h), lambda i: (i, 0)),
                  _const_spec(w), _const_spec(b),
                  pl.BlockSpec((tn, 1), lambda i: (i, 0)),
                  pl.BlockSpec((tn, 1), lambda i: (i, 0))],
        out_specs=(pl.BlockSpec((tn, c_pad), lambda i: (i, 0)),
                   pl.BlockSpec(memory_space=pltpu.MemorySpace.SMEM)),
        scratch_shapes=[pltpu.SMEM((2,), jnp.float32)],
        compiler_params=pltpu.CompilerParams(dimension_semantics=("arbitrary",)),
    )(x2d, w, b, labels2d, mask2d)
    return loss[0, 0], logits_pad[:, :NUM_LABELS]


def classifier_logits(x2d, w, b):
    n, h = x2d.shape
    c_pad = w.shape[1]
    tn = 8 if n % 8 == 0 else n
    logits_pad = pl.pallas_call(
        _classifier_kernel,
        out_shape=jax.ShapeDtypeStruct((n, c_pad), jnp.float32),
        grid=(n // tn,),
        in_specs=[pl.BlockSpec((tn, h), lambda i: (i, 0)),
                  _const_spec(w), _const_spec(b)],
        out_specs=pl.BlockSpec((tn, c_pad), lambda i: (i, 0)),
        compiler_params=pltpu.CompilerParams(dimension_semantics=("parallel",)),
    )(x2d, w, b)
    return logits_pad[:, :NUM_LABELS]


# ----------------------------- model -----------------------------

def init_params(key):
    kit = iter(jax.random.split(key, 4 + NUM_LAYERS * 4))

    def nrm(shape):
        return jax.random.normal(next(kit), shape, dtype=jnp.float32) * 0.02

    zeros = lambda s: jnp.zeros(s, jnp.float32)
    ones = lambda s: jnp.ones(s, jnp.float32)

    # Classifier padded to 128 lanes; only the first NUM_LABELS columns are real.
    cls_w = jnp.zeros((HIDDEN, LANE), jnp.float32).at[:, :NUM_LABELS].set(
        nrm((HIDDEN, NUM_LABELS)))

    params = {
        "word_emb": nrm((VOCAB, HIDDEN)),
        "pos_emb": nrm((MAX_POS, HIDDEN)),
        "type_emb": nrm((2, HIDDEN)),
        "emb_ln_g": ones((1, HIDDEN)), "emb_ln_b": zeros((1, HIDDEN)),
        # MXU weights stored bf16 (f32 accumulation in-kernel); biases / LN in f32.
        "cls_w": cls_w.astype(jnp.bfloat16),
        "cls_b": zeros((1, LANE)),
        "layers": [],
    }
    q_scale = 1.0 / math.sqrt(HEAD_DIM)
    for _ in range(NUM_LAYERS):
        # Head-major fused QKV weights: (num_heads, H, [q|k|v]*head_dim), with the
        # 1/sqrt(head_dim) attention scale folded into the Q columns at init.
        wqkv = nrm((NUM_HEADS, HIDDEN, 3 * HEAD_DIM))
        wqkv = wqkv.at[..., :HEAD_DIM].multiply(q_scale)
        params["layers"].append({
            "wqkv": wqkv.astype(jnp.bfloat16),
            "bqkv": zeros((NUM_HEADS, 1, 3 * HEAD_DIM)),   # (q-part would need q_scale too if nonzero)
            "wo": nrm((NUM_HEADS, HEAD_DIM, HIDDEN)).astype(jnp.bfloat16),
            "bo": zeros((1, HIDDEN)),
            "ln1_g": ones((1, HIDDEN)), "ln1_b": zeros((1, HIDDEN)),
            "w1": nrm((HIDDEN, INTERMEDIATE)).astype(jnp.bfloat16),
            "b1": zeros((1, INTERMEDIATE)),
            "w2": nrm((INTERMEDIATE, HIDDEN)).astype(jnp.bfloat16),
            "b2": zeros((1, HIDDEN)),
            "ln2_g": ones((1, HIDDEN)), "ln2_b": zeros((1, HIDDEN)),
        })
    return params


def spanbert_for_re_forward(params, input_ids, attention_mask, labels=None):
    B, S = input_ids.shape

    # Fused embedding gather + add + LayerNorm (bf16 activations leave the kernel).
    x = embed_layernorm(input_ids, params["word_emb"], params["pos_emb"][:S],
                        params["type_emb"][:1], params["emb_ln_g"],
                        params["emb_ln_b"])                         # (B, S, H) bf16

    # Additive padding-mask bias (BERT extended attention mask), computed once.
    mask_bias = ((1.0 - attention_mask.astype(jnp.float32)) * -10000.0).reshape(B, 1, S)

    # One fused Pallas kernel per encoder layer; activations stay VMEM-resident per layer.
    for lp in params["layers"]:
        x = encoder_layer(x, mask_bias, lp)

    # nn.Dropout(0.3) is the identity in eval/inference mode.
    x2d = x.reshape(B * S, HIDDEN)

    if labels is None:
        return classifier_logits(x2d, params["cls_w"], params["cls_b"]).reshape(
            B, S, NUM_LABELS)

    loss, logits = classifier_with_loss(
        x2d, params["cls_w"], params["cls_b"],
        labels.reshape(B * S, 1).astype(jnp.int32),
        attention_mask.astype(jnp.float32).reshape(B * S, 1))
    return loss, logits.reshape(B, S, NUM_LABELS)


if __name__ == "__main__":
    key = jax.random.PRNGKey(0)
    pkey, ikey, lkey = jax.random.split(key, 3)
    params = init_params(pkey)

    B, S = 2, 8
    input_ids = jax.random.randint(ikey, (B, S), 0, VOCAB, dtype=jnp.int32)
    attention_mask = jnp.array([[1, 1, 1, 1, 1, 1, 1, 1],
                                [1, 1, 1, 1, 1, 1, 0, 0]], dtype=jnp.int32)
    labels = jax.random.randint(lkey, (B, S), 0, NUM_LABELS, dtype=jnp.int32)

    fwd = jax.jit(spanbert_for_re_forward)
    loss, logits = fwd(params, input_ids, attention_mask, labels)
    jax.block_until_ready((loss, logits))

    assert logits.shape == (B, S, NUM_LABELS)
    assert loss.shape == ()
    assert bool(jnp.isfinite(loss))

    # Also exercise the labels=None path (logits only).
    fwd_nolabel = jax.jit(lambda p, i, m: spanbert_for_re_forward(p, i, m))
    logits_only = fwd_nolabel(params, input_ids, attention_mask)
    jax.block_until_ready(logits_only)
    assert logits_only.shape == (B, S, NUM_LABELS)

    print("KERNEL_OK")
</pallas_src>

<mosaic_0001>
module attributes {stable_mosaic.version = 11 : i64} {
  func.func @_embed_ln_kernel(%arg0: i32, %arg1: memref<1x8x1xi32, #tpu.memory_space<vmem>>, %arg2: memref<128x32xf32, #tpu.memory_space<vmem>>, %arg3: memref<8x32xf32, #tpu.memory_space<vmem>>, %arg4: memref<1x32xf32, #tpu.memory_space<vmem>>, %arg5: memref<1x32xf32, #tpu.memory_space<vmem>>, %arg6: memref<1x32xf32, #tpu.memory_space<vmem>>, %arg7: memref<1x8x32xbf16, #tpu.memory_space<vmem>>) attributes {dimension_semantics = [#tpu.dimension_semantics<parallel>], iteration_bounds = array<i64: 2>, scalar_prefetch = 0 : i64, scratch_operands = 0 : i64, tpu.core_type = #tpu.core_type<tc>, window_params = [{transform_indices = @transform_0, window_bounds = array<i64: 1, 8, 1>}, {pipeline_mode = #tpu.pipeline_mode<synchronous>, transform_indices = @transform_1, window_bounds = array<i64: 128, 32>}, {pipeline_mode = #tpu.pipeline_mode<synchronous>, transform_indices = @transform_2, window_bounds = array<i64: 8, 32>}, {pipeline_mode = #tpu.pipeline_mode<synchronous>, transform_indices = @transform_3, window_bounds = array<i64: 1, 32>}, {pipeline_mode = #tpu.pipeline_mode<synchronous>, transform_indices = @transform_4, window_bounds = array<i64: 1, 32>}, {pipeline_mode = #tpu.pipeline_mode<synchronous>, transform_indices = @transform_5, window_bounds = array<i64: 1, 32>}, {transform_indices = @transform_6, window_bounds = array<i64: 1, 8, 32>}]} {
    %c0 = arith.constant 0 : index
    %c0_0 = arith.constant 0 : index
    %c0_1 = arith.constant 0 : index
    %0 = vector.load %arg1[%c0, %c0_0, %c0_1] : memref<1x8x1xi32, #tpu.memory_space<vmem>>, vector<1x8x1xi32>
    %1 = vector.shape_cast %0 : vector<1x8x1xi32> to vector<8x1xi32>
    %2 = tpu.iota {dimensions = array<i32: 1>} : vector<8x128xi32>
    %3 = vector.broadcast %1 : vector<8x1xi32> to vector<8x128xi32>
    %4 = arith.cmpi eq, %2, %3 : vector<8x128xi32>
    %5 = arith.extui %4 : vector<8x128xi1> to vector<8x128xi32>
    %6 = arith.sitofp %5 : vector<8x128xi32> to vector<8x128xf32>
    %c0_2 = arith.constant 0 : index
    %c0_3 = arith.constant 0 : index
    %7 = vector.load %arg2[%c0_2, %c0_3] : memref<128x32xf32, #tpu.memory_space<vmem>>, vector<128x32xf32>
    %cst = arith.constant dense<0.000000e+00> : vector<8x32xf32>
    %8 = tpu.matmul %6, %7, %cst {dimension_numbers = #tpu.dot_dimension_numbers<[1], [0], [0], [1], [0, 0, 1, 1], [], []>} : vector<8x128xf32>, vector<128x32xf32>, vector<8x32xf32> -> vector<8x32xf32>
    %c0_4 = arith.constant 0 : index
    %c0_5 = arith.constant 0 : index
    %9 = vector.load %arg3[%c0_4, %c0_5] : memref<8x32xf32, #tpu.memory_space<vmem>>, vector<8x32xf32>
    %10 = arith.addf %8, %9 : vector<8x32xf32>
    %c0_6 = arith.constant 0 : index
    %c0_7 = arith.constant 0 : index
    %11 = vector.load %arg4[%c0_6, %c0_7] : memref<1x32xf32, #tpu.memory_space<vmem>>, vector<1x32xf32>
    %12 = vector.broadcast %11 : vector<1x32xf32> to vector<8x32xf32>
    %13 = arith.addf %10, %12 : vector<8x32xf32>
    %c0_8 = arith.constant 0 : index
    %c0_9 = arith.constant 0 : index
    %14 = vector.load %arg5[%c0_8, %c0_9] : memref<1x32xf32, #tpu.memory_space<vmem>>, vector<1x32xf32>
    %c0_10 = arith.constant 0 : index
    %c0_11 = arith.constant 0 : index
    %15 = vector.load %arg6[%c0_10, %c0_11] : memref<1x32xf32, #tpu.memory_space<vmem>>, vector<1x32xf32>
    %cst_12 = arith.constant dense<0.000000e+00> : vector<8xf32>
    %16 = vector.multi_reduction <add>, %13, %cst_12 [1] : vector<8x32xf32> to vector<8xf32>
    %17 = vector.shape_cast %16 : vector<8xf32> to vector<8x1xf32>
    %cst_13 = arith.constant 3.200000e+01 : f32
    %18 = vector.broadcast %cst_13 : f32 to vector<8x1xf32>
    %19 = arith.divf %17, %18 : vector<8x1xf32>
    %20 = vector.broadcast %19 : vector<8x1xf32> to vector<8x32xf32>
    %21 = arith.subf %13, %20 : vector<8x32xf32>
    %22 = arith.mulf %21, %21 : vector<8x32xf32>
    %cst_14 = arith.constant dense<0.000000e+00> : vector<8xf32>
    %23 = vector.multi_reduction <add>, %22, %cst_14 [1] : vector<8x32xf32> to vector<8xf32>
    %24 = vector.shape_cast %23 : vector<8xf32> to vector<8x1xf32>
    %cst_15 = arith.constant 3.200000e+01 : f32
    %25 = vector.broadcast %cst_15 : f32 to vector<8x1xf32>
    %26 = arith.divf %24, %25 : vector<8x1xf32>
    %27 = vector.broadcast %19 : vector<8x1xf32> to vector<8x32xf32>
    %28 = arith.subf %13, %27 : vector<8x32xf32>
    %cst_16 = arith.constant 9.99999996E-13 : f32
    %29 = vector.broadcast %cst_16 : f32 to vector<8x1xf32>
    %30 = arith.addf %26, %29 : vector<8x1xf32>
    %31 = math.rsqrt %30 : vector<8x1xf32>
    %32 = vector.broadcast %31 : vector<8x1xf32> to vector<8x32xf32>
    %33 = arith.mulf %28, %32 : vector<8x32xf32>
    %34 = vector.broadcast %14 : vector<1x32xf32> to vector<8x32xf32>
    %35 = arith.mulf %33, %34 : vector<8x32xf32>
    %36 = vector.broadcast %15 : vector<1x32xf32> to vector<8x32xf32>
    %37 = arith.addf %35, %36 : vector<8x32xf32>
    %38 = arith.truncf %37 : vector<8x32xf32> to vector<8x32xbf16>
    %c0_17 = arith.constant 0 : index
    %c0_18 = arith.constant 0 : index
    %c0_19 = arith.constant 0 : index
    %39 = vector.load %arg7[%c0_17, %c0_18, %c0_19] : memref<1x8x32xbf16, #tpu.memory_space<vmem>>, vector<1x8x32xbf16>
    %40 = vector.shape_cast %39 : vector<1x8x32xbf16> to vector<8x32xbf16>
    %41 = vector.shape_cast %38 : vector<8x32xbf16> to vector<1x8x32xbf16>
    tpu.vector_store %arg7[%c0_17, %c0_18, %c0_19], %41 {strides = array<i32>} : memref<1x8x32xbf16, #tpu.memory_space<vmem>>, vector<1x8x32xbf16>,
    return
  }
  func.func @transform_0(%arg0: i32) -> (i32, i32, i32) {
    %c0_i32 = arith.constant 0 : i32
    %c0_i32_0 = arith.constant 0 : i32
    %c0_i32_1 = arith.constant 0 : i32
    return %arg0, %c0_i32, %c0_i32_0 : i32, i32, i32
  }
  func.func @transform_1(%arg0: i32) -> (i32, i32) {
    %c0_i32 = arith.constant 0 : i32
    %c0_i32_0 = arith.constant 0 : i32
    %c0_i32_1 = arith.constant 0 : i32
    return %c0_i32, %c0_i32_0 : i32, i32
  }
  func.func @transform_2(%arg0: i32) -> (i32, i32) {
    %c0_i32 = arith.constant 0 : i32
    %c0_i32_0 = arith.constant 0 : i32
    %c0_i32_1 = arith.constant 0 : i32
    return %c0_i32, %c0_i32_0 : i32, i32
  }
  func.func @transform_3(%arg0: i32) -> (i32, i32) {
    %c0_i32 = arith.constant 0 : i32
    %c0_i32_0 = arith.constant 0 : i32
    %c0_i32_1 = arith.constant 0 : i32
    return %c0_i32, %c0_i32_0 : i32, i32
  }
  func.func @transform_4(%arg0: i32) -> (i32, i32) {
    %c0_i32 = arith.constant 0 : i32
    %c0_i32_0 = arith.constant 0 : i32
    %c0_i32_1 = arith.constant 0 : i32
    return %c0_i32, %c0_i32_0 : i32, i32
  }
  func.func @transform_5(%arg0: i32) -> (i32, i32) {
    %c0_i32 = arith.constant 0 : i32
    %c0_i32_0 = arith.constant 0 : i32
    %c0_i32_1 = arith.constant 0 : i32
    return %c0_i32, %c0_i32_0 : i32, i32
  }
  func.func @transform_6(%arg0: i32) -> (i32, i32, i32) {
    %c0_i32 = arith.constant 0 : i32
    %c0_i32_0 = arith.constant 0 : i32
    %c0_i32_1 = arith.constant 0 : i32
    return %arg0, %c0_i32, %c0_i32_0 : i32, i32, i32
  }
}

module attributes {stable_mosaic.version = 11 : i64} {
  func.func @_encoder_layer_kernel(%arg0: i32, %arg1: memref<1x8x32xbf16, #tpu.memory_space<vmem>>, %arg2: memref<1x1x8xf32, #tpu.memory_space<vmem>>, %arg3: memref<4x32x24xbf16, #tpu.memory_space<vmem>>, %arg4: memref<4x1x24xf32, #tpu.memory_space<vmem>>, %arg5: memref<4x8x32xbf16, #tpu.memory_space<vmem>>, %arg6: memref<1x32xf32, #tpu.memory_space<vmem>>, %arg7: memref<1x32xf32, #tpu.memory_space<vmem>>, %arg8: memref<1x32xf32, #tpu.memory_space<vmem>>, %arg9: memref<32x64xbf16, #tpu.memory_space<vmem>>, %arg10: memref<1x64xf32, #tpu.memory_space<vmem>>, %arg11: memref<64x32xbf16, #tpu.memory_space<vmem>>, %arg12: memref<1x32xf32, #tpu.memory_space<vmem>>, %arg13: memref<1x32xf32, #tpu.memory_space<vmem>>, %arg14: memref<1x32xf32, #tpu.memory_space<vmem>>, %arg15: memref<1x8x32xbf16, #tpu.memory_space<vmem>>) attributes {dimension_semantics = [#tpu.dimension_semantics<parallel>], iteration_bounds = array<i64: 2>, scalar_prefetch = 0 : i64, scratch_operands = 0 : i64, tpu.core_type = #tpu.core_type<tc>, window_params = [{transform_indices = @transform_0, window_bounds = array<i64: 1, 8, 32>}, {transform_indices = @transform_1, window_bounds = array<i64: 1, 1, 8>}, {pipeline_mode = #tpu.pipeline_mode<synchronous>, transform_indices = @transform_2, window_bounds = array<i64: 4, 32, 24>}, {pipeline_mode = #tpu.pipeline_mode<synchronous>, transform_indices = @transform_3, window_bounds = array<i64: 4, 1, 24>}, {pipeline_mode = #tpu.pipeline_mode<synchronous>, transform_indices = @transform_4, window_bounds = array<i64: 4, 8, 32>}, {pipeline_mode = #tpu.pipeline_mode<synchronous>, transform_indices = @transform_5, window_bounds = array<i64: 1, 32>}, {pipeline_mode = #tpu.pipeline_mode<synchronous>, transform_indices = @transform_6, window_bounds = array<i64: 1, 32>}, {pipeline_mode = #tpu.pipeline_mode<synchronous>, transform_indices = @transform_7, window_bounds = array<i64: 1, 32>}, {pipeline_mode = #tpu.pipeline_mode<synchronous>, transform_indices = @transform_8, window_bounds = array<i64: 32, 64>}, {pipeline_mode = #tpu.pipeline_mode<synchronous>, transform_indices = @transform_9, window_bounds = array<i64: 1, 64>}, {pipeline_mode = #tpu.pipeline_mode<synchronous>, transform_indices = @transform_10, window_bounds = array<i64: 64, 32>}, {pipeline_mode = #tpu.pipeline_mode<synchronous>, transform_indices = @transform_11, window_bounds = array<i64: 1, 32>}, {pipeline_mode = #tpu.pipeline_mode<synchronous>, transform_indices = @transform_12, window_bounds = array<i64: 1, 32>}, {pipeline_mode = #tpu.pipeline_mode<synchronous>, transform_indices = @transform_13, window_bounds = array<i64: 1, 32>}, {transform_indices = @transform_14, window_bounds = array<i64: 1, 8, 32>}]} {
    %c0 = arith.constant 0 : index
    %c0_0 = arith.constant 0 : index
    %c0_1 = arith.constant 0 : index
    %0 = vector.load %arg1[%c0, %c0_0, %c0_1] : memref<1x8x32xbf16, #tpu.memory_space<vmem>>, vector<1x8x32xbf16>
    %1 = vector.shape_cast %0 : vector<1x8x32xbf16> to vector<8x32xbf16>
    %2 = arith.extf %1 : vector<8x32xbf16> to vector<8x32xf32>
    %c0_2 = arith.constant 0 : index
    %c0_3 = arith.constant 0 : index
    %c0_4 = arith.constant 0 : index
    %3 = vector.load %arg2[%c0_2, %c0_3, %c0_4] : memref<1x1x8xf32, #tpu.memory_space<vmem>>, vector<1x1x8xf32>
    %4 = vector.shape_cast %1 : vector<8x32xbf16> to vector<1x8x32xbf16>
    %5 = vector.broadcast %4 : vector<1x8x32xbf16> to vector<4x8x32xbf16>
    %c0_5 = arith.constant 0 : index
    %c0_6 = arith.constant 0 : index
    %c0_7 = arith.constant 0 : index
    %6 = vector.load %arg3[%c0_5, %c0_6, %c0_7] : memref<4x32x24xbf16, #tpu.memory_space<vmem>>, vector<4x32x24xbf16>
    "tpu.trace_start"() <{level = 10 : i32, message = "hsd,hdf->hsf"}> : () -> ()
    %cst = arith.constant dense<0.000000e+00> : vector<4x8x24xf32>
    %7 = tpu.matmul %5, %6, %cst {dimension_numbers = #tpu.dot_dimension_numbers<[2], [1], [1], [2], [0, 0, 0, 1, 1, 2], [0], [0]>} : vector<4x8x32xbf16>, vector<4x32x24xbf16>, vector<4x8x24xf32> -> vector<4x8x24xf32>
    "tpu.trace_stop"() : () -> ()
    %c0_8 = arith.constant 0 : index
    %c0_9 = arith.constant 0 : index
    %c0_10 = arith.constant 0 : index
    %8 = vector.load %arg4[%c0_8, %c0_9, %c0_10] : memref<4x1x24xf32, #tpu.memory_space<vmem>>, vector<4x1x24xf32>
    %9 = vector.broadcast %8 : vector<4x1x24xf32> to vector<4x8x24xf32>
    %10 = arith.addf %7, %9 : vector<4x8x24xf32>
    %11 = arith.truncf %10 : vector<4x8x24xf32> to vector<4x8x24xbf16>
    %12 = vector.extract_strided_slice %11 {offsets = [0, 0, 0], sizes = [4, 8, 8], strides = [1, 1, 1]} : vector<4x8x24xbf16> to vector<4x8x8xbf16>
    %13 = vector.extract_strided_slice %11 {offsets = [0, 0, 8], sizes = [4, 8, 8], strides = [1, 1, 1]} : vector<4x8x24xbf16> to vector<4x8x8xbf16>
    %14 = vector.extract_strided_slice %11 {offsets = [0, 0, 16], sizes = [4, 8, 8], strides = [1, 1, 1]} : vector<4x8x24xbf16> to vector<4x8x8xbf16>
    "tpu.trace_start"() <{level = 10 : i32, message = "hqd,hkd->hqk"}> : () -> ()
    %cst_11 = arith.constant dense<0.000000e+00> : vector<4x8x8xf32>
    %15 = tpu.matmul %12, %13, %cst_11 {dimension_numbers = #tpu.dot_dimension_numbers<[2], [2], [1], [1], [0, 0, 0, 1, 1, 1], [0], [0]>} : vector<4x8x8xbf16>, vector<4x8x8xbf16>, vector<4x8x8xf32> -> vector<4x8x8xf32>
    "tpu.trace_stop"() : () -> ()
    %16 = vector.broadcast %3 : vector<1x1x8xf32> to vector<4x8x8xf32>
    %17 = arith.addf %15, %16 : vector<4x8x8xf32>
    %cst_12 = arith.constant dense<0xFF800000> : vector<4x8xf32>
    %18 = vector.multi_reduction <maximumf>, %17, %cst_12 [2] : vector<4x8x8xf32> to vector<4x8xf32>
    %19 = vector.shape_cast %18 : vector<4x8xf32> to vector<4x8x1xf32>
    %20 = vector.broadcast %19 : vector<4x8x1xf32> to vector<4x8x8xf32>
    %21 = arith.subf %17, %20 : vector<4x8x8xf32>
    %22 = math.exp %21 : vector<4x8x8xf32>
    %cst_13 = arith.constant dense<0.000000e+00> : vector<4x8xf32>
    %23 = vector.multi_reduction <add>, %22, %cst_13 [2] : vector<4x8x8xf32> to vector<4x8xf32>
    %24 = vector.shape_cast %23 : vector<4x8xf32> to vector<4x8x1xf32>
    %25 = tpu.reciprocal %24 {approx = true} : vector<4x8x1xf32> -> vector<4x8x1xf32>
    %26 = vector.broadcast %25 : vector<4x8x1xf32> to vector<4x8x8xf32>
    %27 = arith.mulf %22, %26 : vector<4x8x8xf32>
    %28 = arith.truncf %27 : vector<4x8x8xf32> to vector<4x8x8xbf16>
    "tpu.trace_start"() <{level = 10 : i32, message = "hqk,hkd->hqd"}> : () -> ()
    %cst_14 = arith.constant dense<0.000000e+00> : vector<4x8x8xf32>
    %29 = tpu.matmul %28, %14, %cst_14 {dimension_numbers = #tpu.dot_dimension_numbers<[2], [1], [1], [2], [0, 0, 0, 1, 1, 2], [0], [0]>} : vector<4x8x8xbf16>, vector<4x8x8xbf16>, vector<4x8x8xf32> -> vector<4x8x8xf32>
    "tpu.trace_stop"() : () -> ()
    %30 = arith.truncf %29 : vector<4x8x8xf32> to vector<4x8x8xbf16>
    %c0_15 = arith.constant 0 : index
    %c0_16 = arith.constant 0 : index
    %c0_17 = arith.constant 0 : index
    %31 = vector.load %arg5[%c0_15, %c0_16, %c0_17] : memref<4x8x32xbf16, #tpu.memory_space<vmem>>, vector<4x8x32xbf16>
    "tpu.trace_start"() <{level = 10 : i32, message = "hsd,hdk->hsk"}> : () -> ()
    %cst_18 = arith.constant dense<0.000000e+00> : vector<4x8x32xf32>
    %32 = tpu.matmul %30, %31, %cst_18 {dimension_numbers = #tpu.dot_dimension_numbers<[2], [1], [1], [2], [0, 0, 0, 1, 1, 2], [0], [0]>} : vector<4x8x8xbf16>, vector<4x8x32xbf16>, vector<4x8x32xf32> -> vector<4x8x32xf32>
    "tpu.trace_stop"() : () -> ()
    %cst_19 = arith.constant dense<0.000000e+00> : vector<8x32xf32>
    %33 = vector.multi_reduction <add>, %32, %cst_19 [0] : vector<4x8x32xf32> to vector<8x32xf32>
    %c0_20 = arith.constant 0 : index
    %c0_21 = arith.constant 0 : index
    %34 = vector.load %arg6[%c0_20, %c0_21] : memref<1x32xf32, #tpu.memory_space<vmem>>, vector<1x32xf32>
    %35 = vector.broadcast %34 : vector<1x32xf32> to vector<8x32xf32>
    %36 = arith.addf %33, %35 : vector<8x32xf32>
    %37 = arith.addf %36, %2 : vector<8x32xf32>
    %c0_22 = arith.constant 0 : index
    %c0_23 = arith.constant 0 : index
    %38 = vector.load %arg7[%c0_22, %c0_23] : memref<1x32xf32, #tpu.memory_space<vmem>>, vector<1x32xf32>
    %c0_24 = arith.constant 0 : index
    %c0_25 = arith.constant 0 : index
    %39 = vector.load %arg8[%c0_24, %c0_25] : memref<1x32xf32, #tpu.memory_space<vmem>>, vector<1x32xf32>
    %cst_26 = arith.constant dense<0.000000e+00> : vector<8xf32>
    %40 = vector.multi_reduction <add>, %37, %cst_26 [1] : vector<8x32xf32> to vector<8xf32>
    %41 = vector.shape_cast %40 : vector<8xf32> to vector<8x1xf32>
    %cst_27 = arith.constant 3.200000e+01 : f32
    %42 = vector.broadcast %cst_27 : f32 to vector<8x1xf32>
    %43 = arith.divf %41, %42 : vector<8x1xf32>
    %44 = vector.broadcast %43 : vector<8x1xf32> to vector<8x32xf32>
    %45 = arith.subf %37, %44 : vector<8x32xf32>
    %46 = arith.mulf %45, %45 : vector<8x32xf32>
    %cst_28 = arith.constant dense<0.000000e+00> : vector<8xf32>
    %47 = vector.multi_reduction <add>, %46, %cst_28 [1] : vector<8x32xf32> to vector<8xf32>
    %48 = vector.shape_cast %47 : vector<8xf32> to vector<8x1xf32>
    %cst_29 = arith.constant 3.200000e+01 : f32
    %49 = vector.broadcast %cst_29 : f32 to vector<8x1xf32>
    %50 = arith.divf %48, %49 : vector<8x1xf32>
    %51 = vector.broadcast %43 : vector<8x1xf32> to vector<8x32xf32>
    %52 = arith.subf %37, %51 : vector<8x32xf32>
    %cst_30 = arith.constant 9.99999996E-13 : f32
    %53 = vector.broadcast %cst_30 : f32 to vector<8x1xf32>
    %54 = arith.addf %50, %53 : vector<8x1xf32>
    %55 = math.rsqrt %54 : vector<8x1xf32>
    %56 = vector.broadcast %55 : vector<8x1xf32> to vector<8x32xf32>
    %57 = arith.mulf %52, %56 : vector<8x32xf32>
    %58 = vector.broadcast %38 : vector<1x32xf32> to vector<8x32xf32>
    %59 = arith.mulf %57, %58 : vector<8x32xf32>
    %60 = vector.broadcast %39 : vector<1x32xf32> to vector<8x32xf32>
    %61 = arith.addf %59, %60 : vector<8x32xf32>
    %c0_31 = arith.constant 0 : index
    %c0_32 = arith.constant 0 : index
    %62 = vector.load %arg9[%c0_31, %c0_32] : memref<32x64xbf16, #tpu.memory_space<vmem>>, vector<32x64xbf16>
    %c0_33 = arith.constant 0 : index
    %c0_34 = arith.constant 0 : index
    %63 = vector.load %arg10[%c0_33, %c0_34] : memref<1x64xf32, #tpu.memory_space<vmem>>, vector<1x64xf32>
    %64 = arith.truncf %61 : vector<8x32xf32> to vector<8x32xbf16>
    %cst_35 = arith.constant dense<0.000000e+00> : vector<8x64xf32>
    %65 = tpu.matmul %64, %62, %cst_35 {dimension_numbers = #tpu.dot_dimension_numbers<[1], [0], [0], [1], [0, 0, 1, 1], [], []>} : vector<8x32xbf16>, vector<32x64xbf16>, vector<8x64xf32> -> vector<8x64xf32>
    %66 = vector.broadcast %63 : vector<1x64xf32> to vector<8x64xf32>
    %67 = arith.addf %65, %66 : vector<8x64xf32>
    %cst_36 = arith.constant 5.000000e-01 : f32
    %68 = vector.broadcast %cst_36 : f32 to vector<8x64xf32>
    %69 = arith.mulf %68, %67 : vector<8x64xf32>
    %cst_37 = arith.constant 0.707106769 : f32
    %70 = vector.broadcast %cst_37 : f32 to vector<8x64xf32>
    %71 = arith.mulf %67, %70 : vector<8x64xf32>
    %cst_38 = arith.constant 0.000000e+00 : f32
    %72 = vector.broadcast %cst_38 : f32 to vector<8x64xf32>
    %73 = arith.cmpf oge, %71, %72 : vector<8x64xf32>
    %cst_39 = arith.constant 1.000000e+00 : f32
    %cst_40 = arith.constant -1.000000e+00 : f32
    %74 = vector.broadcast %cst_39 : f32 to vector<8x64xf32>
    %75 = vector.broadcast %cst_40 : f32 to vector<8x64xf32>
    %76 = arith.select %73, %74, %75 : vector<8x64xi1>, vector<8x64xf32>
    %77 = math.absf %71 : vector<8x64xf32>
    %cst_41 = arith.constant 0.327591091 : f32
    %78 = vector.broadcast %cst_41 : f32 to vector<8x64xf32>
    %79 = arith.mulf %78, %77 : vector<8x64xf32>
    %cst_42 = arith.constant 1.000000e+00 : f32
    %80 = vector.broadcast %cst_42 : f32 to vector<8x64xf32>
    %81 = arith.addf %80, %79 : vector<8x64xf32>
    %82 = tpu.reciprocal %81 {approx = true} : vector<8x64xf32> -> vector<8x64xf32>
    %cst_43 = arith.constant 1.06140542 : f32
    %83 = vector.broadcast %cst_43 : f32 to vector<8x64xf32>
    %84 = arith.mulf %83, %82 : vector<8x64xf32>
    %cst_44 = arith.constant -1.45315206 : f32
    %85 = vector.broadcast %cst_44 : f32 to vector<8x64xf32>
    %86 = arith.addf %84, %85 : vector<8x64xf32>
    %87 = arith.mulf %86, %82 : vector<8x64xf32>
    %cst_45 = arith.constant 1.42141378 : f32
    %88 = vector.broadcast %cst_45 : f32 to vector<8x64xf32>
    %89 = arith.addf %87, %88 : vector<8x64xf32>
    %90 = arith.mulf %89, %82 : vector<8x64xf32>
    %cst_46 = arith.constant -0.284496725 : f32
    %91 = vector.broadcast %cst_46 : f32 to vector<8x64xf32>
    %92 = arith.addf %90, %91 : vector<8x64xf32>
    %93 = arith.mulf %92, %82 : vector<8x64xf32>
    %cst_47 = arith.constant 0.254829586 : f32
    %94 = vector.broadcast %cst_47 : f32 to vector<8x64xf32>
    %95 = arith.addf %93, %94 : vector<8x64xf32>
    %96 = arith.mulf %95, %82 : vector<8x64xf32>
    %cst_48 = arith.constant 0.000000e+00 : f32
    %97 = vector.broadcast %cst_48 : f32 to vector<8x64xf32>
    %98 = arith.subf %97, %77 : vector<8x64xf32>
    %99 = arith.mulf %98, %77 : vector<8x64xf32>
    %100 = math.exp %99 : vector<8x64xf32>
    %101 = arith.mulf %96, %100 : vector<8x64xf32>
    %cst_49 = arith.constant 1.000000e+00 : f32
    %102 = vector.broadcast %cst_49 : f32 to vector<8x64xf32>
    %103 = arith.subf %102, %101 : vector<8x64xf32>
    %104 = arith.mulf %76, %103 : vector<8x64xf32>
    %cst_50 = arith.constant 1.000000e+00 : f32
    %105 = vector.broadcast %cst_50 : f32 to vector<8x64xf32>
    %106 = arith.addf %105, %104 : vector<8x64xf32>
    %107 = arith.mulf %69, %106 : vector<8x64xf32>
    %c0_51 = arith.constant 0 : index
    %c0_52 = arith.constant 0 : index
    %108 = vector.load %arg11[%c0_51, %c0_52] : memref<64x32xbf16, #tpu.memory_space<vmem>>, vector<64x32xbf16>
    %c0_53 = arith.constant 0 : index
    %c0_54 = arith.constant 0 : index
    %109 = vector.load %arg12[%c0_53, %c0_54] : memref<1x32xf32, #tpu.memory_space<vmem>>, vector<1x32xf32>
    %110 = arith.truncf %107 : vector<8x64xf32> to vector<8x64xbf16>
    %cst_55 = arith.constant dense<0.000000e+00> : vector<8x32xf32>
    %111 = tpu.matmul %110, %108, %cst_55 {dimension_numbers = #tpu.dot_dimension_numbers<[1], [0], [0], [1], [0, 0, 1, 1], [], []>} : vector<8x64xbf16>, vector<64x32xbf16>, vector<8x32xf32> -> vector<8x32xf32>
    %112 = vector.broadcast %109 : vector<1x32xf32> to vector<8x32xf32>
    %113 = arith.addf %111, %112 : vector<8x32xf32>
    %114 = arith.addf %113, %61 : vector<8x32xf32>
    %c0_56 = arith.constant 0 : index
    %c0_57 = arith.constant 0 : index
    %115 = vector.load %arg13[%c0_56, %c0_57] : memref<1x32xf32, #tpu.memory_space<vmem>>, vector<1x32xf32>
    %c0_58 = arith.constant 0 : index
    %c0_59 = arith.constant 0 : index
    %116 = vector.load %arg14[%c0_58, %c0_59] : memref<1x32xf32, #tpu.memory_space<vmem>>, vector<1x32xf32>
    %cst_60 = arith.constant dense<0.000000e+00> : vector<8xf32>
    %117 = vector.multi_reduction <add>, %114, %cst_60 [1] : vector<8x32xf32> to vector<8xf32>
    %118 = vector.shape_cast %117 : vector<8xf32> to vector<8x1xf32>
    %cst_61 = arith.constant 3.200000e+01 : f32
    %119 = vector.broadcast %cst_61 : f32 to vector<8x1xf32>
    %120 = arith.divf %118, %119 : vector<8x1xf32>
    %121 = vector.broadcast %120 : vector<8x1xf32> to vector<8x32xf32>
    %122 = arith.subf %114, %121 : vector<8x32xf32>
    %123 = arith.mulf %122, %122 : vector<8x32xf32>
    %cst_62 = arith.constant dense<0.000000e+00> : vector<8xf32>
    %124 = vector.multi_reduction <add>, %123, %cst_62 [1] : vector<8x32xf32> to vector<8xf32>
    %125 = vector.shape_cast %124 : vector<8xf32> to vector<8x1xf32>
    %cst_63 = arith.constant 3.200000e+01 : f32
    %126 = vector.broadcast %cst_63 : f32 to vector<8x1xf32>
    %127 = arith.divf %125, %126 : vector<8x1xf32>
    %128 = vector.broadcast %120 : vector<8x1xf32> to vector<8x32xf32>
    %129 = arith.subf %114, %128 : vector<8x32xf32>
    %cst_64 = arith.constant 9.99999996E-13 : f32
    %130 = vector.broadcast %cst_64 : f32 to vector<8x1xf32>
    %131 = arith.addf %127, %130 : vector<8x1xf32>
    %132 = math.rsqrt %131 : vector<8x1xf32>
    %133 = vector.broadcast %132 : vector<8x1xf32> to vector<8x32xf32>
    %134 = arith.mulf %129, %133 : vector<8x32xf32>
    %135 = vector.broadcast %115 : vector<1x32xf32> to vector<8x32xf32>
    %136 = arith.mulf %134, %135 : vector<8x32xf32>
    %137 = vector.broadcast %116 : vector<1x32xf32> to vector<8x32xf32>
    %138 = arith.addf %136, %137 : vector<8x32xf32>
    %139 = arith.truncf %138 : vector<8x32xf32> to vector<8x32xbf16>
    %c0_65 = arith.constant 0 : index
    %c0_66 = arith.constant 0 : index
    %c0_67 = arith.constant 0 : index
    %140 = vector.load %arg15[%c0_65, %c0_66, %c0_67] : memref<1x8x32xbf16, #tpu.memory_space<vmem>>, vector<1x8x32xbf16>
    %141 = vector.shape_cast %140 : vector<1x8x32xbf16> to vector<8x32xbf16>
    %142 = vector.shape_cast %139 : vector<8x32xbf16> to vector<1x8x32xbf16>
    tpu.vector_store %arg15[%c0_65, %c0_66, %c0_67], %142 {strides = array<i32>} : memref<1x8x32xbf16, #tpu.memory_space<vmem>>, vector<1x8x32xbf16>,
    return
  }
  func.func @transform_0(%arg0: i32) -> (i32, i32, i32) {
    %c0_i32 = arith.constant 0 : i32
    %c0_i32_0 = arith.constant 0 : i32
    %c0_i32_1 = arith.constant 0 : i32
    return %arg0, %c0_i32, %c0_i32_0 : i32, i32, i32
  }
  func.func @transform_1(%arg0: i32) -> (i32, i32, i32) {
    %c0_i32 = arith.constant 0 : i32
    %c0_i32_0 = arith.constant 0 : i32
    %c0_i32_1 = arith.constant 0 : i32
    return %arg0, %c0_i32, %c0_i32_0 : i32, i32, i32
  }
  func.func @transform_2(%arg0: i32) -> (i32, i32, i32) {
    %c0_i32 = arith.constant 0 : i32
    %c0_i32_0 = arith.constant 0 : i32
    %c0_i32_1 = arith.constant 0 : i32
    %c0_i32_2 = arith.constant 0 : i32
    return %c0_i32, %c0_i32_0, %c0_i32_1 : i32, i32, i32
  }
  func.func @transform_3(%arg0: i32) -> (i32, i32, i32) {
    %c0_i32 = arith.constant 0 : i32
    %c0_i32_0 = arith.constant 0 : i32
    %c0_i32_1 = arith.constant 0 : i32
    %c0_i32_2 = arith.constant 0 : i32
    return %c0_i32, %c0_i32_0, %c0_i32_1 : i32, i32, i32
  }
  func.func @transform_4(%arg0: i32) -> (i32, i32, i32) {
    %c0_i32 = arith.constant 0 : i32
    %c0_i32_0 = arith.constant 0 : i32
    %c0_i32_1 = arith.constant 0 : i32
    %c0_i32_2 = arith.constant 0 : i32
    return %c0_i32, %c0_i32_0, %c0_i32_1 : i32, i32, i32
  }
  func.func @transform_5(%arg0: i32) -> (i32, i32) {
    %c0_i32 = arith.constant 0 : i32
    %c0_i32_0 = arith.constant 0 : i32
    %c0_i32_1 = arith.constant 0 : i32
    return %c0_i32, %c0_i32_0 : i32, i32
  }
  func.func @transform_6(%arg0: i32) -> (i32, i32) {
    %c0_i32 = arith.constant 0 : i32
    %c0_i32_0 = arith.constant 0 : i32
    %c0_i32_1 = arith.constant 0 : i32
    return %c0_i32, %c0_i32_0 : i32, i32
  }
  func.func @transform_7(%arg0: i32) -> (i32, i32) {
    %c0_i32 = arith.constant 0 : i32
    %c0_i32_0 = arith.constant 0 : i32
    %c0_i32_1 = arith.constant 0 : i32
    return %c0_i32, %c0_i32_0 : i32, i32
  }
  func.func @transform_8(%arg0: i32) -> (i32, i32) {
    %c0_i32 = arith.constant 0 : i32
    %c0_i32_0 = arith.constant 0 : i32
    %c0_i32_1 = arith.constant 0 : i32
    return %c0_i32, %c0_i32_0 : i32, i32
  }
  func.func @transform_9(%arg0: i32) -> (i32, i32) {
    %c0_i32 = arith.constant 0 : i32
    %c0_i32_0 = arith.constant 0 : i32
    %c0_i32_1 = arith.constant 0 : i32
    return %c0_i32, %c0_i32_0 : i32, i32
  }
  func.func @transform_10(%arg0: i32) -> (i32, i32) {
    %c0_i32 = arith.constant 0 : i32
    %c0_i32_0 = arith.constant 0 : i32
    %c0_i32_1 = arith.constant 0 : i32
    return %c0_i32, %c0_i32_0 : i32, i32
  }
  func.func @transform_11(%arg0: i32) -> (i32, i32) {
    %c0_i32 = arith.constant 0 : i32
    %c0_i32_0 = arith.constant 0 : i32
    %c0_i32_1 = arith.constant 0 : i32
    return %c0_i32, %c0_i32_0 : i32, i32
  }
  func.func @transform_12(%arg0: i32) -> (i32, i32) {
    %c0_i32 = arith.constant 0 : i32
    %c0_i32_0 = arith.constant 0 : i32
    %c0_i32_1 = arith.constant 0 : i32
    return %c0_i32, %c0_i32_0 : i32, i32
  }
  func.func @transform_13(%arg0: i32) -> (i32, i32) {
    %c0_i32 = arith.constant 0 : i32
    %c0_i32_0 = arith.constant 0 : i32
    %c0_i32_1 = arith.constant 0 : i32
    return %c0_i32, %c0_i32_0 : i32, i32
  }
  func.func @transform_14(%arg0: i32) -> (i32, i32, i32) {
    %c0_i32 = arith.constant 0 : i32
    %c0_i32_0 = arith.constant 0 : i32
    %c0_i32_1 = arith.constant 0 : i32
    return %arg0, %c0_i32, %c0_i32_0 : i32, i32, i32
  }
}

module attributes {stable_mosaic.version = 11 : i64} {
  func.func @_classifier_ce_kernel(%arg0: i32, %arg1: memref<8x32xbf16, #tpu.memory_space<vmem>>, %arg2: memref<32x128xbf16, #tpu.memory_space<vmem>>, %arg3: memref<1x128xf32, #tpu.memory_space<vmem>>, %arg4: memref<8x1xi32, #tpu.memory_space<vmem>>, %arg5: memref<8x1xf32, #tpu.memory_space<vmem>>, %arg6: memref<8x128xf32, #tpu.memory_space<vmem>>, %arg7: memref<1x1xf32, #tpu.memory_space<smem>>, %arg8: memref<2xf32, #tpu.memory_space<smem>>) attributes {dimension_semantics = [#tpu.dimension_semantics<arbitrary>], iteration_bounds = array<i64: 2>, scalar_prefetch = 0 : i64, scratch_operands = 1 : i64, tpu.core_type = #tpu.core_type<tc>, window_params = [{transform_indices = @transform_0, window_bounds = array<i64: 8, 32>}, {pipeline_mode = #tpu.pipeline_mode<synchronous>, transform_indices = @transform_1, window_bounds = array<i64: 32, 128>}, {pipeline_mode = #tpu.pipeline_mode<synchronous>, transform_indices = @transform_2, window_bounds = array<i64: 1, 128>}, {transform_indices = @transform_3, window_bounds = array<i64: 8, 1>}, {transform_indices = @transform_4, window_bounds = array<i64: 8, 1>}, {transform_indices = @transform_5, window_bounds = array<i64: 8, 128>}, {transform_indices = @transform_6, window_bounds = array<i64: 1, 1>}]} {
    %c0_i32 = arith.constant 0 : i32
    %0 = arith.cmpi eq, %arg0, %c0_i32 : i32
    %1 = arith.extui %0 : i1 to i32
    %c0_i32_0 = arith.constant 0 : i32
    %2 = arith.cmpi ne, %1, %c0_i32_0 : i32
    scf.if %2 {
      %cst_25 = arith.constant 0.000000e+00 : f32
      %c0_26 = arith.constant 0 : index
      %60 = memref.load %arg8[%c0_26] : memref<2xf32, #tpu.memory_space<smem>>
      memref.store %cst_25, %arg8[%c0_26] : memref<2xf32, #tpu.memory_space<smem>>
      %cst_27 = arith.constant 0.000000e+00 : f32
      %c1_28 = arith.constant 1 : index
      %61 = memref.load %arg8[%c1_28] : memref<2xf32, #tpu.memory_space<smem>>
      memref.store %cst_27, %arg8[%c1_28] : memref<2xf32, #tpu.memory_space<smem>>
    } else {
    }
    %c0 = arith.constant 0 : index
    %c0_1 = arith.constant 0 : index
    %3 = vector.load %arg1[%c0, %c0_1] : memref<8x32xbf16, #tpu.memory_space<vmem>>, vector<8x32xbf16>
    %c0_2 = arith.constant 0 : index
    %c0_3 = arith.constant 0 : index
    %4 = vector.load %arg2[%c0_2, %c0_3] : memref<32x128xbf16, #tpu.memory_space<vmem>>, vector<32x128xbf16>
    %c0_4 = arith.constant 0 : index
    %c0_5 = arith.constant 0 : index
    %5 = vector.load %arg3[%c0_4, %c0_5] : memref<1x128xf32, #tpu.memory_space<vmem>>, vector<1x128xf32>
    %cst = arith.constant dense<0.000000e+00> : vector<8x128xf32>
    %6 = tpu.matmul %3, %4, %cst {dimension_numbers = #tpu.dot_dimension_numbers<[1], [0], [0], [1], [0, 0, 1, 1], [], []>} : vector<8x32xbf16>, vector<32x128xbf16>, vector<8x128xf32> -> vector<8x128xf32>
    %7 = vector.broadcast %5 : vector<1x128xf32> to vector<8x128xf32>
    %8 = arith.addf %6, %7 : vector<8x128xf32>
    %c0_6 = arith.constant 0 : index
    %c0_7 = arith.constant 0 : index
    %9 = vector.load %arg6[%c0_6, %c0_7] : memref<8x128xf32, #tpu.memory_space<vmem>>, vector<8x128xf32>
    tpu.vector_store %arg6[%c0_6, %c0_7], %8 {strides = array<i32>} : memref<8x128xf32, #tpu.memory_space<vmem>>, vector<8x128xf32>,
    %10 = tpu.iota {dimensions = array<i32: 1>} : vector<8x128xi32>
    %c5_i32 = arith.constant 5 : i32
    %11 = vector.broadcast %c5_i32 : i32 to vector<8x128xi32>
    %12 = arith.cmpi slt, %10, %11 : vector<8x128xi32>
    %cst_8 = arith.constant -1.000000e+30 : f32
    %13 = vector.broadcast %cst_8 : f32 to vector<8x128xf32>
    %14 = arith.select %12, %8, %13 : vector<8x128xi1>, vector<8x128xf32>
    %cst_9 = arith.constant dense<0xFF800000> : vector<8xf32>
    %15 = vector.multi_reduction <maximumf>, %14, %cst_9 [1] : vector<8x128xf32> to vector<8xf32>
    %16 = vector.shape_cast %15 : vector<8xf32> to vector<8x1xf32>
    %17 = vector.broadcast %16 : vector<8x1xf32> to vector<8x128xf32>
    %18 = arith.subf %14, %17 : vector<8x128xf32>
    %19 = math.exp %18 : vector<8x128xf32>
    %cst_10 = arith.constant 0.000000e+00 : f32
    %20 = vector.broadcast %cst_10 : f32 to vector<8x128xf32>
    %21 = arith.select %12, %19, %20 : vector<8x128xi1>, vector<8x128xf32>
    %cst_11 = arith.constant dense<0.000000e+00> : vector<8xf32>
    %22 = vector.multi_reduction <add>, %21, %cst_11 [1] : vector<8x128xf32> to vector<8xf32>
    %23 = vector.shape_cast %22 : vector<8xf32> to vector<8x1xf32>
    %24 = math.log %23 : vector<8x1xf32>
    %25 = arith.addf %24, %16 : vector<8x1xf32>
    %c0_12 = arith.constant 0 : index
    %c0_13 = arith.constant 0 : index
    %26 = vector.load %arg4[%c0_12, %c0_13] : memref<8x1xi32, #tpu.memory_space<vmem>>, vector<8x1xi32>
    %c0_14 = arith.constant 0 : index
    %c0_15 = arith.constant 0 : index
    %27 = vector.load %arg5[%c0_14, %c0_15] : memref<8x1xf32, #tpu.memory_space<vmem>>, vector<8x1xf32>
    %cst_16 = arith.constant 5.000000e-01 : f32
    %28 = vector.broadcast %cst_16 : f32 to vector<8x1xf32>
    %29 = arith.cmpf ogt, %27, %28 : vector<8x1xf32>
    %c-100_i32 = arith.constant -100 : i32
    %30 = vector.broadcast %c-100_i32 : i32 to vector<8x1xi32>
    %31 = arith.cmpi ne, %26, %30 : vector<8x1xi32>
    %32 = arith.andi %29, %31 : vector<8x1xi1>
    %33 = arith.extui %32 : vector<8x1xi1> to vector<8x1xi32>
    %34 = arith.sitofp %33 : vector<8x1xi32> to vector<8x1xf32>
    %35 = vector.broadcast %26 : vector<8x1xi32> to vector<8x128xi32>
    %36 = arith.cmpi eq, %10, %35 : vector<8x128xi32>
    %cst_17 = arith.constant 0.000000e+00 : f32
    %37 = vector.broadcast %cst_17 : f32 to vector<8x128xf32>
    %38 = arith.select %36, %8, %37 : vector<8x128xi1>, vector<8x128xf32>
    %cst_18 = arith.constant dense<0.000000e+00> : vector<8xf32>
    %39 = vector.multi_reduction <add>, %38, %cst_18 [1] : vector<8x128xf32> to vector<8xf32>
    %40 = vector.shape_cast %39 : vector<8xf32> to vector<8x1xf32>
    %41 = arith.subf %25, %40 : vector<8x1xf32>
    %c0_19 = arith.constant 0 : index
    %42 = memref.load %arg8[%c0_19] : memref<2xf32, #tpu.memory_space<smem>>
    %43 = arith.mulf %41, %34 : vector<8x1xf32>
    %44 = vector.shape_cast %43 : vector<8x1xf32> to vector<1x8x1xf32>
    %cst_20 = arith.constant dense<0.000000e+00> : vector<1xf32>
    %45 = vector.multi_reduction <add>, %44, %cst_20 [1, 2] : vector<1x8x1xf32> to vector<1xf32>
    %46 = vector.shape_cast %45 : vector<1xf32> to vector<1x1x1xf32>
    %47 = vector.extract %46[0, 0, 0] : f32 from vector<1x1x1xf32>
    %48 = arith.addf %42, %47 : f32
    %c0_21 = arith.constant 0 : index
    %49 = memref.load %arg8[%c0_21] : memref<2xf32, #tpu.memory_space<smem>>
    memref.store %48, %arg8[%c0_21] : memref<2xf32, #tpu.memory_space<smem>>
    %c1 = arith.constant 1 : index
    %50 = memref.load %arg8[%c1] : memref<2xf32, #tpu.memory_space<smem>>
    %51 = vector.shape_cast %34 : vector<8x1xf32> to vector<1x8x1xf32>
    %cst_22 = arith.constant dense<0.000000e+00> : vector<1xf32>
    %52 = vector.multi_reduction <add>, %51, %cst_22 [1, 2] : vector<1x8x1xf32> to vector<1xf32>
    %53 = vector.shape_cast %52 : vector<1xf32> to vector<1x1x1xf32>
    %54 = vector.extract %53[0, 0, 0] : f32 from vector<1x1x1xf32>
    %55 = arith.addf %50, %54 : f32
    %c1_23 = arith.constant 1 : index
    %56 = memref.load %arg8[%c1_23] : memref<2xf32, #tpu.memory_space<smem>>
    memref.store %55, %arg8[%c1_23] : memref<2xf32, #tpu.memory_space<smem>>
    %c1_i32 = arith.constant 1 : i32
    %57 = arith.cmpi eq, %arg0, %c1_i32 : i32
    %58 = arith.extui %57 : i1 to i32
    %c0_i32_24 = arith.constant 0 : i32
    %59 = arith.cmpi ne, %58, %c0_i32_24 : i32
    scf.if %59 {
      %c0_25 = arith.constant 0 : index
      %60 = memref.load %arg8[%c0_25] : memref<2xf32, #tpu.memory_space<smem>>
      %c1_26 = arith.constant 1 : index
      %61 = memref.load %arg8[%c1_26] : memref<2xf32, #tpu.memory_space<smem>>
      %62 = arith.divf %60, %61 : f32
      %c0_27 = arith.constant 0 : index
      %c0_28 = arith.constant 0 : index
      %63 = memref.load %arg7[%c0_27, %c0_28] : memref<1x1xf32, #tpu.memory_space<smem>>
      memref.store %62, %arg7[%c0_27, %c0_28] : memref<1x1xf32, #tpu.memory_space<smem>>
    } else {
    }
    return
  }
  func.func @transform_0(%arg0: i32) -> (i32, i32) {
    %c0_i32 = arith.constant 0 : i32
    %c0_i32_0 = arith.constant 0 : i32
    return %arg0, %c0_i32 : i32, i32
  }
  func.func @transform_1(%arg0: i32) -> (i32, i32) {
    %c0_i32 = arith.constant 0 : i32
    %c0_i32_0 = arith.constant 0 : i32
    %c0_i32_1 = arith.constant 0 : i32
    return %c0_i32, %c0_i32_0 : i32, i32
  }
  func.func @transform_2(%arg0: i32) -> (i32, i32) {
    %c0_i32 = arith.constant 0 : i32
    %c0_i32_0 = arith.constant 0 : i32
    %c0_i32_1 = arith.constant 0 : i32
    return %c0_i32, %c0_i32_0 : i32, i32
  }
  func.func @transform_3(%arg0: i32) -> (i32, i32) {
    %c0_i32 = arith.constant 0 : i32
    %c0_i32_0 = arith.constant 0 : i32
    return %arg0, %c0_i32 : i32, i32
  }
  func.func @transform_4(%arg0: i32) -> (i32, i32) {
    %c0_i32 = arith.constant 0 : i32
    %c0_i32_0 = arith.constant 0 : i32
    return %arg0, %c0_i32 : i32, i32
  }
  func.func @transform_5(%arg0: i32) -> (i32, i32) {
    %c0_i32 = arith.constant 0 : i32
    %c0_i32_0 = arith.constant 0 : i32
    return %arg0, %c0_i32 : i32, i32
  }
  func.func @transform_6(%arg0: i32) -> (i32, i32) {
    %c0_i32 = arith.constant 0 : i32
    %c0_i32_0 = arith.constant 0 : i32
    %c0_i32_1 = arith.constant 0 : i32
    return %c0_i32, %c0_i32_0 : i32, i32
  }
}

</mosaic_0001>

<bundles_post_ra>
// kernel: spanbert_for_re_forward.4
= control target key start
LH: loop header
LB: loop body
LE: loop exit
PB: predicated region body
PF: predicated region fallthrough
CT: control target
= control target key end

     0   :  { %s592_s21 = smov 0   ;;  %s673_s0 = inlined_call_operand.vmem [shape: s32[2,8,1], index: 0, kind: input, shape index: {}]   ;;  %s674_s1 = inlined_call_operand.vmem [shape: f32[128,32], index: 1, kind: input, shape index: {}]   ;;  %s675_s2 = inlined_call_operand.vmem [shape: f32[8,32], index: 2, kind: input, shape index: {}]   ;;  %s676_s3 = inlined_call_operand.vmem [shape: f32[1,32], index: 3, kind: input, shape index: {}]   ;;  %s677_s4 = inlined_call_operand.vmem [shape: f32[1,32], index: 4, kind: input, shape index: {}]   ;;  %s678_s5 = inlined_call_operand.vmem [shape: f32[1,32], index: 5, kind: input, shape index: {}]   ;;  %s679_s6 = inlined_call_operand.vmem [shape: bf16[2,8,32], index: 6, kind: output, shape index: {}]  }
   0x1 LB: > { %s438_s22 = sadd.s32 4294967295, %s550_s21   ;;  %p442_p0 = scmp.ge.s32.totalorder %s550_s21, 1  ;;  %s550_s21 = sphi %s592_s21, %s16_s21  }
   0x2   : > { %p211_p1 = scmp.lt.s32.totalorder %s550_s21, 3 }
   0x4   : > { %p212_p2 = pnand %p442_p0, %p211_p1 }
   0x5   : > { %p239_p3 = scmp.lt.s32.totalorder (!%p212_p2), %s438_s22, 1  ;;  %v256_v0 = vld [vmem:[%s674_s1] sm:$0xff] (!%p212_p2)  ;;  %v257_v1 = vld [vmem:[%s674_s1 + $0x8] sm:$0xff] (!%p212_p2)  ;;  %v258_v2 = vld [vmem:[%s674_s1 + $0x10] sm:$0xff] (!%p212_p2)  ;;  %v552_v3 = vmov (!%p212_p2), 0   ;;  %v553_v4 = vmov (!%p212_p2), 0.0|0.0   ;;  %v248_v28 = vlaneseq (!%p212_p2) }
   0x6   : > { %215 = sbr.rel (%p212_p2) target bundleno = 678 (0x2a6), region = 44  ;;  %541 = vset.pattern.permute.xlu0 (!%p212_p2), %v552_v3  ;;  %504 = vmatprep.subr.bf16.mxu0 (!%p212_p2), %v553_v4  ;;  %v505_v5 = vpack.c.bf16 (!%p212_p2), %v257_v1, %v256_v0  ;;  %v259_v6 = vld [vmem:[%s674_s1 + $0x18] sm:$0xff] (!%p212_p2)  ;;  %v260_v8 = vld [vmem:[%s674_s1 + $0x20] sm:$0xff] (!%p212_p2)  ;;  %v261_v9 = vld [vmem:[%s674_s1 + $0x28] sm:$0xff] (!%p212_p2)  ;;  %vm554_vm0 = vmmov (!%p212_p2), 0   ;;  %v555_v14 = vmov (!%p212_p2), 0.0  }
   0x7   : > { %v508_v7 = vpack.c.bf16 (!%p212_p2), %v259_v6, %v258_v2  ;;  %v511_v11 = vpack.c.bf16 (!%p212_p2), %v261_v9, %v260_v8  ;;  %v262_v12 = vld [vmem:[%s674_s1 + $0x30] sm:$0xff] (!%p212_p2)  ;;  %v263_v13 = vld [vmem:[%s674_s1 + $0x38] sm:$0xff] (!%p212_p2)  ;;  %501 = vmatprep.mubr.msk.f32.mxu0 (!%p212_p2), %vm554_vm0, %v555_v14  ;;  %v264_v16 = vld [vmem:[%s674_s1 + $0x40] sm:$0xff] (!%p212_p2)  ;;  %v249_v29 = vand.u32 (!%p212_p2), 127, %v248_v28  ;;  %v556_v31 = vmov (!%p212_p2), 1.0  }
   0x8   : > { %506 = vmatpush3.bf16.msra.mxu0 (!%p212_p2), %v505_v5  ;;  %v514_v15 = vpack.c.bf16 (!%p212_p2), %v263_v13, %v262_v12  ;;  %v265_v17 = vld [vmem:[%s674_s1 + $0x48] sm:$0xff] (!%p212_p2)  ;;  %v266_v19 = vld [vmem:[%s674_s1 + $0x50] sm:$0xff] (!%p212_p2)  ;;  %v267_v20 = vld [vmem:[%s674_s1 + $0x58] sm:$0xff] (!%p212_p2)  ;;  %vm353_vm2 = vcmask (!%p212_p2), 261120   ;;  %vm383_vm3 = vcmask (!%p212_p2), 257024  }
   0x9   : > { %507 = vmatprep.subr.bf16.mxu0 (!%p212_p2), %v553_v4  ;;  %v517_v18 = vpack.c.bf16 (!%p212_p2), %v265_v17, %v264_v16  ;;  %v520_v21 = vpack.c.bf16 (!%p212_p2), %v267_v20, %v266_v19  ;;  %v268_v22 = vld [vmem:[%s674_s1 + $0x60] sm:$0xff] (!%p212_p2)  ;;  %v269_v23 = vld [vmem:[%s674_s1 + $0x68] sm:$0xff] (!%p212_p2)  ;;  %v270_v25 = vld [vmem:[%s674_s1 + $0x70] sm:$0xff] (!%p212_p2) }
   0xa   : > { %v523_v24 = vpack.c.bf16 (!%p212_p2), %v269_v23, %v268_v22  ;;  %v271_v26 = vld [vmem:[%s674_s1 + $0x78] sm:$0xff] (!%p212_p2)  ;;  %v272_v32 = vld [vmem:[%s675_s2] sm:$0xff] (!%p212_p2) }
   0xb   : > { %v526_v27 = vpack.c.bf16 (!%p212_p2), %v271_v26, %v270_v25  ;;  %v447_v34 = vld [vmem:[%s676_s3] ss:$0 sm:$0xff] (!%p212_p2) }
   0xc   : > { %509 = vmatpush3.bf16.msra.mxu0 (!%p212_p2), %v508_v7  ;;  %v448_v48 = vld [vmem:[%s677_s4] ss:$0 sm:$0xff] (!%p212_p2) }
   0xd   : > { %s681_s22 = smov (!%p239_p3, %s438_s22), 1  ;;  %510 = vmatprep.subr.bf16.mxu0 %v553_v4  ;;  %v449_v50 = vld [vmem:[%s678_s5] ss:$0 sm:$0xff] }
   0xe   : > { %s443_s7 = sshll.u32 %s681_s22, 3  ;;  %s444_s23 = sshll.u32 %s681_s22, 2 }
   0xf   : > { %s242_s14 = scalar_lea.vmem %s673_s0, %s443_s7  ;;  %s246_s26 = scalar_lea.vmem %s679_s6, %s444_s23 }
  0x10   : > { %v247_v10 = vld [vmem:[%s242_s14] sm:$0xff]  ;;  %512 = vmatpush3.bf16.msra.mxu0 %v511_v11 }
  0x11   : > { %251 = vperm.xlu0 %541, %v247_v10   ;;  %513 = vmatprep.subr.bf16.mxu0 %v553_v4 }
  0x14   : > { %515 = vmatpush3.bf16.msra.mxu0 %v514_v15 }
  0x15   : > { %516 = vmatprep.subr.bf16.mxu0 %v553_v4 }
  0x18   : > { %518 = vmatpush3.bf16.msra.mxu0 %v517_v18 }
  0x19   : > { %519 = vmatprep.subr.bf16.mxu0 %v553_v4 }
  0x1c   : > { %521 = vmatpush3.bf16.msra.mxu0 %v520_v21 }
  0x1d   : > { %522 = vmatprep.subr.bf16.mxu0 %v553_v4 }
  0x20   : > { %524 = vmatpush3.bf16.msra.mxu0 %v523_v24 }
  0x21   : > { %525 = vmatprep.subr.bf16.mxu0 %v553_v4 }
  0x24   : > { %527 = vmatpush3.bf16.msra.mxu0 %v526_v27 }
  0x90   : > { %v252_v30 = vpop.permute.xlu0 %251 }
  0x91   : > { %vm253_vm1 = vcmp.eq.s32.totalorder %v249_v29, %v252_v30 }
  0x92   : > { %502 = vmatmul.mubr.msk.f32.vlgmr.msra.gmra.mrb[0].mxu0 %vm253_vm1, %v556_v31 }
 0x165   : > { %v339_v33 = vpop.f32.mrb[0].mxu0 }
 0x166   : > { %v340_v35 = vadd.f32 %v339_v33, %v272_v32  ;;  %v503_v36 = vpop.f32.mrb[1].mxu0 }
 0x168   : > { %v350_v37 = vadd.f32 %v447_v34, %v340_v35 }
 0x16a   : > { %v354_v38 = vsel %vm353_vm2, %v350_v37, 0.0 }
 0x16b   : > { %355 = vadd.xlane.f32.xlu0 %v354_v38 }
 0x1f8   : > { %v356_v39 = vpop.xlane.xlu0 %355 }
 0x1f9   : > { %v358_v40 = vmul.f32 0.03125, %v356_v39 }
 0x1fb   : > { %v359_v41 = vsub.f32 %v350_v37, %v358_v40 }
 0x1fd   : > { %v360_v42 = vmul.f32 %v359_v41, %v359_v41 }
 0x1ff   : > { %v361_v43 = vsel %vm353_vm2, %v360_v42, 0.0 }
 0x200   : > { %362 = vadd.xlane.f32.xlu1 %v361_v43 }
 0x28d   : > { %v363_v44 = vpop.xlane.xlu1 %362 }
 0x28e   : > { %v364_v45 = vmul.f32 0.03125, %v363_v44 }
 0x290   : > { %v365_v46 = vadd.f32 1e-12, %v364_v45 }
 0x292   : > { %542 = vrsqrt.f32 %v365_v46 }
 0x29c   : > { %v543_v47 = vpop.eup %542 }
 0x29d   : > { %v367_v49 = vmul.f32 %v543_v47, %v359_v41 }
 0x29f   : > { %v374_v51 = vmul.f32 %v448_v48, %v367_v49 }
 0x2a1   : > { %v381_v52 = vadd.f32 %v449_v50, %v374_v51 }
 0x2a3   : > { %v382_v53 = vpack.c.bf16 %v381_v52, %v381_v52 }
 0x2a5   : > { %384 = vst.msk [vmem:[%s246_s26] sm:$0xf] %vm383_vm3, %v382_v53 }
 0x2a6 PF: > { %s16_s21 = sadd.s32 1, %s550_s21  }
 0x2a7   : > { %p13_p4 = scmp.ge.s32.totalorder %s16_s21, 4  }
 0x2a9   :  { %15 = sbr.rel (!%p13_p4) target bundleno = 1 (0x1), region = 74 }

// kernel: spanbert_for_re_forward.7
= control target key start
LH: loop header
LB: loop body
LE: loop exit
PB: predicated region body
PF: predicated region fallthrough
CT: control target
= control target key end

     0   :  { %12 = vsyncpa [#allocation4], 0  ;;  %s665_s21 = smov 0   ;;  %s723_s0 = inlined_call_operand.vmem [shape: bf16[16,32], index: 0, kind: input, shape index: {}]   ;;  %s724_s1 = inlined_call_operand.vmem [shape: bf16[32,128], index: 1, kind: input, shape index: {}]   ;;  %s725_s2 = inlined_call_operand.vmem [shape: f32[1,128], index: 2, kind: input, shape index: {}]   ;;  %s726_s3 = inlined_call_operand.vmem [shape: s32[16,1], index: 3, kind: input, shape index: {}]   ;;  %s727_s4 = inlined_call_operand.vmem [shape: f32[16,1], index: 4, kind: input, shape index: {}]   ;;  %s728_s5 = inlined_call_operand.vmem [shape: f32[16,128], index: 5, kind: output, shape index: {0}]   ;;  %s729_s6 = inlined_call_operand.hbm [shape: f32[1,1], index: 6, kind: output, shape index: {1}]  }
   0x1 LB: > { %s671_s22 = sadd.s32 4294967295, %s623_s21   ;;  %p534_p0 = scmp.ge.s32.totalorder %s623_s21, 1  ;;  %s623_s21 = sphi %s665_s21, %s18_s21  }
   0x2   : > { %p228_p1 = scmp.lt.s32.totalorder %s623_s21, 3 }
   0x4   : > { %p229_p2 = pnand %p534_p0, %p228_p1 }
   0x5   : > { %v625_v0 = vmov (!%p229_p2), 0.0   ;;  %v593_v1 = vld [vmem:[%s724_s1] sm:$0xff] (!%p229_p2)   ;;  %vm626_vm0 = vmmov (!%p229_p2), 0   ;;  %p264_p3 = scmp.lt.s32.totalorder (!%p229_p2), %s671_s22, 1  ;;  %v594_v2 = vld [vmem:[%s724_s1 + $0x8] sm:$0xff] (!%p229_p2)   ;;  %vm313_vm1 = vcmask (!%p229_p2), 261120   ;;  %v358_v5 = vlaneseq (!%p229_p2) }
   0x6   : > { %232 = sbr.rel (%p229_p2) target bundleno = 850 (0x352), region = 40  ;;  %555 = vmatprep.subr.bf16.mxu0 (!%p229_p2), %v625_v0  ;;  %559 = vmatprep.mubr.msk.bf16.mxu0 (!%p229_p2), %vm626_vm0, %v625_v0  ;;  %v627_v4 = vmov (!%p229_p2), 0   ;;  %v540_v7 = vld [vmem:[%s725_s2] ss:$0 sm:$0xff] (!%p229_p2)  ;;  %vm390_vm7 = vcmask (!%p229_p2), 7168   ;;  %p576_p4 = scmp.eq.s32.totalorder (!%p229_p2), %s671_s22, 0 }
   0x7   : > { %556 = vmatpush3.bf16.msra.mxu0 (!%p229_p2), %v593_v1  ;;  %592 = vset.pattern.permute.xlu0 (!%p229_p2), %v627_v4  ;;  %v359_v6 = vand.u32 (!%p229_p2), 127, %v358_v5  ;;  %s628_s20 = smov (!%p229_p2), 0.0   ;;  %p546_p5 = scmp.ne.s32.totalorder (!%p229_p2), %s671_s22, 1 }
   0x8   : > { %557 = vmatprep.subr.bf16.mxu0 (!%p229_p2), %v625_v0 }
   0x9   : > { %vm360_vm2 = vcmp.lt.s32.totalorder (!%p229_p2), %v359_v6, 5 }
   0xb   : > { %558 = vmatpush3.bf16.msra.mxu0 (!%p229_p2), %v594_v2 }
   0xd   : > { %s265_s27 = scalar_select %p264_p3, %s671_s22, 1 }
   0xe   : > { %570 = sst [smem:[#allocation2]] (%p576_p4), %s628_s20 }
   0xf   : > { %s535_s28 = sshll.u32 %s265_s27, 2  ;;  %s686_s8 = sshll.u32 %s265_s27, 3 }
  0x10   : > { %s267_s7 = scalar_lea.vmem %s723_s0, %s535_s28  ;;  %s279_s13 = scalar_lea.vmem %s728_s5, %s686_s8 }
  0x11   : > { %v289_v3 = vld [vmem:[%s267_s7] sm:$0xf]  ;;  %s271_s16 = scalar_lea.vmem %s726_s3, %s686_s8  ;;  %s275_s19 = scalar_lea.vmem %s727_s4, %s686_s8 }
  0x12   : > { %560 = vmatmul.mubr.msk.bf16.vlgmr.msra.gmra.mrb[0].mxu0 %vm313_vm1, %v289_v3  ;;  %v373_v14 = vld [vmem:[%s271_s16] sm:$0xff]  ;;  %571 = sst [smem:[#allocation2 + $0x1]] (%p576_p4), %s628_s20  ;;  %s388_s23 = sld [smem:[#allocation2]] }
  0x13   : > { %v374_v23 = vld [vmem:[%s275_s19] sm:$0xff]  ;;  %vm376_vm5 = vcmp.ne.s32.totalorder %v373_v14, 4294967196  ;;  %s545_s24 = sld [smem:[#allocation2 + $0x1]] }
  0x14   : > { %vm375_vm4 = vcmp.gt.f32.partialorder %v374_v23, 0.5 }
  0x15   : > { %vm377_vm6 = vmand %vm375_vm4, %vm376_vm5 }
  0x16   : > { %v544_v28 = vsel %vm377_vm6, 1.0, %v625_v0 }
  0x17   : > { %v405_v32 = vsel %vm390_vm7, %v544_v28, 0.0 }
  0xe5   : > { %v351_v8 = vpop.f32.mrb[0].mxu0 }
  0xe6   : > { %v352_v9 = vadd.f32 %v540_v7, %v351_v8  ;;  %v561_v10 = vpop.f32.mrb[1].mxu0 }
  0xe7   : > { %v354_v11 = vpop.f32.mrb[2].mxu0 }
  0xe8   : > { %v562_v12 = vpop.f32.mrb[3].mxu0  ;;  %v361_v13 = vsel %vm360_vm2, %v352_v9, -1e+30  ;;  %357 = vst [vmem:[%s279_s13] sm:$0xff] %v352_v9 }
  0xe9   : > { %362 = vmax.xlane.f32.xlu0 %v361_v13 }
  0xff   : > { %381 = vperm.xlu0 %592, %v373_v14  }
 0x176   : > { %v363_v15 = vpop.xlane.xlu0 %362 }
 0x177   : > { %v364_v16 = vsub.f32 %v361_v13, %v363_v15 }
 0x179   : > { %v365_v17 = vmul.f32 1.442695, %v364_v16 }
 0x17b   : > { %595 = vpow2.f32 %v365_v17 }
 0x17e   : > { %v382_v18 = vpop.permute.xlu0 %381 }
 0x17f   : > { %vm383_vm3 = vcmp.eq.s32.totalorder %v359_v6, %v382_v18 }
 0x180   : > { %v384_v21 = vsel %vm383_vm3, %v352_v9, 0.0 }
 0x185   : > { %v596_v19 = vpop.eup %595 }
 0x186   : > { %v367_v20 = vsel %vm360_vm2, %v596_v19, 0.0 }
 0x187   : > { %368 = vadd.xlane.f32.xlu1 %v367_v20 }
 0x18b   : > { %385 = vadd.xlane.f32.xlu1 %v384_v21 }
 0x214   : > { %v369_v22 = vpop.xlane.xlu1 %368 }
 0x215   : > { %597 = vlog2.f32 %v369_v22 }
 0x218   : > { %v386_v27 = vpop.xlane.xlu1 %385 }
 0x21f   : > { %v598_v24 = vpop.eup %597 }
 0x220   : > { %v371_v25 = vmul.f32 0.6931472, %v598_v24 }
 0x222   : > { %v372_v26 = vadd.f32 %v371_v25, %v363_v15 }
 0x224   : > { %v387_v29 = vsub.f32 %v372_v26, %v386_v27 }
 0x226   : > { %v389_v30 = vmul.f32 %v544_v28, %v387_v29 }
 0x228   : > { %v391_v31 = vsel %vm390_vm7, %v389_v30, 0.0 }
 0x229   : > { %392 = vadd.xlane.f32.xlu1 %v391_v31 }
 0x22d   : > { %406 = vadd.xlane.f32.xlu1 %v405_v32 }
 0x2b6   : > { %v393_v33 = vpop.xlane.xlu1 %392 }
 0x2b7   : > { %v394_v34 = vrot.slane %v393_v33, 4 }
 0x2b9   : > { %v395_v35 = vadd.f32 %v394_v34, %v393_v33 }
 0x2ba   : > { %v407_v36 = vpop.xlane.xlu1 %406 }
 0x2bb   : > { %v396_v37 = vrot.slane %v395_v35, 2  ;;  %v408_v38 = vrot.slane %v407_v36, 4 }
 0x2bd   : > { %v409_v39 = vadd.f32 %v408_v38, %v407_v36  ;;  %v397_v40 = vadd.f32 %v396_v37, %v395_v35 }
 0x2bf   : > { %v410_v41 = vrot.slane %v409_v39, 2  ;;  %v398_v42 = vrot.slane %v397_v40, 1 }
 0x2c1   : > { %v411_v43 = vadd.f32 %v410_v41, %v409_v39  ;;  %v399_v44 = vadd.f32 %v398_v42, %v397_v40 }
 0x2c3   : > { %563 = vpush %v399_v44  ;;  %v412_v45 = vrot.slane %v411_v43, 1 }
 0x2c5   : > { %v413_v46 = vadd.f32 %v412_v45, %v411_v43 }
 0x2c7   : > { %565 = vpush %v413_v46 }
 0x2f4   : > { %s564_s25 = spop %563 }
 0x2f5   : > { %s401_s26 = sadd.f32 %s564_s25, %s388_s23  ;;  %421 = sbr.rel (%p546_p5) target bundleno = 835 (0x343), region = 48 }
 0x2f7   : > { %403 = sst [smem:[#allocation2]] %s401_s26 }
 0x2f8   : > { %s566_s27 = spop %565  ;;  %s422_s30 = sld [smem:[#allocation2]] (!%p546_p5) }
 0x2f9   : > { %s415_s28 = sadd.f32 %s566_s27, %s545_s24 }
 0x2fb   : > { %417 = sst [smem:[#allocation2 + $0x1]] %s415_s28 }
 0x2fc   : > { %s547_s29 = sld [smem:[#allocation2 + $0x1]] }
 0x302   : > { %v424_v47 = vstv %s547_s29 }
 0x303   : > { %599 = vrcp.f32 %v424_v47 }
 0x30d   : > { %v600_v48 = vpop.eup %599 }
 0x30e   : > { %567 = vpush %v600_v48 }
 0x33f   : > { %s568_s7 = spop %567 }
 0x340   : > { %s427_s8 = smul.f32 %s568_s7, %s422_s30 }
 0x342   : > { %429 = sst [smem:[#allocation3]] %s427_s8 }
 0x343 PF: > { %p577_p6 = scmp.eq.s32.totalorder %s671_s22, 1  ;;  %s601_s11 = scalar_lea.hbm %s729_s6, 16 }
 0x344   : > { %p602_p7 = scmp.ne.s32.totalorder %s729_s6, %s601_s11  ;;  %p607_p10 = scmp.lt.u32.totalorder %s601_s11, %s729_s6 }
 0x346   : > { %p603_p8 = pnand %p602_p7, %p577_p6 }
 0x348   : > { %p604_p9 = pneg %p603_p8 }
 0x34a   : > { %p609_p11 = pnand %p607_p10, %p604_p9 }
 0x34c   : > { %612 = shalt.err (!%p609_p11)
}
 0x34d   : > { %s629_s16 = smov [#allocation3]  }
 0x34e   : > { %573 = dma.smem_to_hbm (%p577_p6), %s629_s16, 16, %s729_s6, [#allocation4]  }
 0x34f   : > { %618 = dma.done.wait (%p577_p6), [#allocation4], 16  }
 0x350   : > { %620 = vsyncadd (%p577_p6), [#allocation4], 4294967280 }
 0x351   : > { %450 = sfence }
 0x352 PF: > { %s18_s21 = sadd.s32 1, %s623_s21  }
 0x353   : > { %p15_p12 = scmp.ge.s32.totalorder %s18_s21, 4  }
 0x355   :  { %17 = sbr.rel (!%p15_p12) target bundleno = 1 (0x1), region = 98 }
 0x35c   :  { %463 = vsyncpa [#allocation4], 1 }
 0x35d   :  { %465 = vsyncpa [#allocation4 + $0x1], 1 }

// kernel: spanbert_for_re_forward.5
= control target key start
LH: loop header
LB: loop body
LE: loop exit
PB: predicated region body
PF: predicated region fallthrough
CT: control target
= control target key end

     0   :  { %s2055_s29 = smov 0   ;;  %s2308_s0 = inlined_call_operand.vmem [shape: bf16[2,8,32], index: 0, kind: input, shape index: {}]   ;;  %s2309_s1 = inlined_call_operand.vmem [shape: f32[2,1,8], index: 1, kind: input, shape index: {}]   ;;  %s2310_s2 = inlined_call_operand.vmem [shape: bf16[4,32,24], index: 2, kind: input, shape index: {}]   ;;  %s2311_s3 = inlined_call_operand.vmem [shape: f32[4,1,24], index: 3, kind: input, shape index: {}]   ;;  %s2312_s4 = inlined_call_operand.vmem [shape: bf16[4,8,32], index: 4, kind: input, shape index: {}]   ;;  %s2313_s5 = inlined_call_operand.vmem [shape: f32[1,32], index: 5, kind: input, shape index: {}]   ;;  %s2314_s6 = inlined_call_operand.vmem [shape: f32[1,32], index: 6, kind: input, shape index: {}]   ;;  %s2315_s7 = inlined_call_operand.vmem [shape: f32[1,32], index: 7, kind: input, shape index: {}]   ;;  %s2316_s8 = inlined_call_operand.vmem [shape: bf16[32,64], index: 8, kind: input, shape index: {}]   ;;  %s2317_s9 = inlined_call_operand.vmem [shape: f32[1,64], index: 9, kind: input, shape index: {}]   ;;  %s2318_s10 = inlined_call_operand.vmem [shape: bf16[64,32], index: 10, kind: input, shape index: {}]   ;;  %s2319_s11 = inlined_call_operand.vmem [shape: f32[1,32], index: 11, kind: input, shape index: {}]   ;;  %s2320_s12 = inlined_call_operand.vmem [shape: f32[1,32], index: 12, kind: input, shape index: {}]   ;;  %s2321_s13 = inlined_call_operand.vmem [shape: f32[1,32], index: 13, kind: input, shape index: {}]   ;;  %s2322_s14 = inlined_call_operand.vmem [shape: bf16[2,8,32], index: 14, kind: output, shape index: {}]  }
   0x1 LB: > { %s1695_s30 = sadd.s32 4294967295, %s1973_s29   ;;  %p1699_p0 = scmp.ge.s32.totalorder %s1973_s29, 1  ;;  %s1973_s29 = sphi %s2055_s29, %s24_s29  }
   0x2   : > { %p419_p1 = scmp.lt.s32.totalorder %s1973_s29, 3 }
   0x4   : > { %p420_p2 = pnand %p1699_p0, %p419_p1 }
   0x5   : > { %v1929_v0 = vld [vmem:[%s2310_s2] sm:$0xff] (!%p420_p2)   ;;  %v1975_v1 = vmov (!%p420_p2), 0.0   ;;  %v1930_v2 = vld [vmem:[%s2310_s2 + $0x10] sm:$0xff] (!%p420_p2)   ;;  %v1931_v3 = vld [vmem:[%s2310_s2 + $0x8] sm:$0xff] (!%p420_p2)   ;;  %vm1976_vm0 = vmmov (!%p420_p2), 0   ;;  %p466_p3 = scmp.lt.s32.totalorder (!%p420_p2), %s1695_s30, 1 }
   0x6   : > { %423 = sbr.rel (%p420_p2) target bundleno = 2442 (0x98a), region = 76  ;;  %1792 = vmatprep.subr.bf16.mxu0 (!%p420_p2), %v1975_v1  ;;  %1800 = vmatprep.subr.bf16.mxu1 (!%p420_p2), %v1975_v1  ;;  %v1932_v4 = vld [vmem:[%s2310_s2 + $0x18] sm:$0xff] (!%p420_p2)   ;;  %vm537_vm1 = vcmask (!%p420_p2), 261120   ;;  %v1933_v5 = vld [vmem:[%s2310_s2 + $0x20] sm:$0xff] (!%p420_p2)   ;;  %v1934_v6 = vld [vmem:[%s2310_s2 + $0x30] sm:$0xff] (!%p420_p2)   ;;  %s1977_s26 = smov (!%p420_p2), 120  }
   0x7   : > { %1793 = vmatpush3.bf16.msra.mxu0 (!%p420_p2), %v1929_v0  ;;  %1796 = vmatprep.mubr.msk.bf16.mxu0 (!%p420_p2), %vm1976_vm0, %v1975_v1  ;;  %v1935_v8 = vld [vmem:[%s2310_s2 + $0x28] sm:$0xff] (!%p420_p2)   ;;  %v1936_v9 = vld [vmem:[%s2310_s2 + $0x38] sm:$0xff] (!%p420_p2)   ;;  %v1702_v10 = vld [vmem:[%s2311_s3] ss:$0 sm:$0xff] (!%p420_p2)  ;;  %vm750_vm2 = vcmask (!%p420_p2), 64512   ;;  %s1978_s20 = smov (!%p420_p2), 112  }
   0x8   : > { %1801 = vmatpush3.bf16.msra.mxu1 (!%p420_p2), %v1930_v2  ;;  %1794 = vmatprep.subr.bf16.mxu0 (!%p420_p2), %v1975_v1  ;;  %v1703_v11 = vld [vmem:[%s2311_s3 + $0x1] ss:$0 sm:$0xff] (!%p420_p2)  ;;  %v1704_v24 = vld [vmem:[%s2311_s3 + $0x2] ss:$0 sm:$0xff] (!%p420_p2)  ;;  %v1705_v25 = vld [vmem:[%s2311_s3 + $0x3] ss:$0 sm:$0xff] (!%p420_p2) }
   0x9   : > { %1802 = vmatprep.subr.bf16.mxu1 (!%p420_p2), %v1975_v1  ;;  %1804 = vmatprep.mubr.msk.bf16.mxu1 (!%p420_p2), %vm1976_vm0, %v1975_v1  ;;  %vm997_vm3 = vcmask (!%p420_p2), 1043456   ;;  %vm1556_vm5 = vcmask (!%p420_p2), 523264   ;;  %vm1631_vm6 = vcmask (!%p420_p2), 257024  }
   0xb   : > { %1795 = vmatpush3.bf16.msra.mxu0 (!%p420_p2), %v1931_v3 }
   0xc   : > { %1803 = vmatpush3.bf16.msra.mxu1 (!%p420_p2), %v1932_v4  ;;  %1808 = vmatprep.subr.bf16.mxu0 (!%p420_p2), %v1975_v1 }
   0xd   : > { %s2324_s30 = smov (!%p466_p3, %s1695_s30), 1  ;;  %1816 = vmatprep.subr.bf16.mxu1 %v1975_v1 }
   0xe   : > { %s1700_s23 = sshll.u32 %s2324_s30, 2  ;;  %s472_s19 = scalar_lea.vmem %s2309_s1, %s2324_s30 }
   0xf   : > { %s469_s28 = scalar_lea.vmem %s2308_s0, %s1700_s23  ;;  %v1718_v46 = vld [vmem:[%s472_s19] ss:$0 sm:$0xff]  ;;  %s476_s18 = scalar_lea.vmem %s2322_s14, %s1700_s23 }
  0x10   : > { %v2098_v7 = vld [vmem:[%s469_s28] sm:$0xf] }
  0x11   : > { %1797 = vmatmul.mubr.msk.bf16.vlgmr.msra.gmra.mrb[0].mxu0 %vm537_vm1, %v2098_v7  ;;  %1805 = vmatmul.mubr.msk.bf16.vlgmr.msra.gmra.mrb[0].mxu1 %vm537_vm1, %v2098_v7 }
  0x12   : > { %1809 = vmatpush3.bf16.msra.mxu0 %v1933_v5  ;;  %1817 = vmatpush3.bf16.msra.mxu1 %v1934_v6 }
  0x13   : > { %1810 = vmatprep.subr.bf16.mxu0 %v1975_v1  ;;  %1818 = vmatprep.subr.bf16.mxu1 %v1975_v1 }
  0x14   : > { %1812 = vmatprep.mubr.msk.bf16.mxu0 %vm1976_vm0, %v1975_v1  ;;  %1820 = vmatprep.mubr.msk.bf16.mxu1 %vm1976_vm0, %v1975_v1 }
  0x16   : > { %1811 = vmatpush3.bf16.msra.mxu0 %v1935_v8  ;;  %1819 = vmatpush3.bf16.msra.mxu1 %v1936_v9 }
  0x17   : > { %1824 = vmatprep.subr.bf16.mxu0 %v1975_v1  ;;  %1830 = vmatprep.subr.bf16.mxu1 %v1975_v1 }
  0x19   : > { %1813 = vmatmul.mubr.msk.bf16.vlgmr.msra.gmra.mrb[4].mxu0 %vm537_vm1, %v2098_v7  ;;  %1821 = vmatmul.mubr.msk.bf16.vlgmr.msra.gmra.mrb[4].mxu1 %vm537_vm1, %v2098_v7 }
  0x1a   : > { %1826 = vmatprep.mubr.msk.bf16.mxu0 %vm1976_vm0, %v1975_v1  ;;  %1832 = vmatprep.mubr.msk.bf16.mxu1 %vm1976_vm0, %v1975_v1 }
  0xe4   : > { %v575_v12 = vpop.f32.mrb[0].mxu0  ;;  %v627_v15 = vpop.f32.mrb[0].mxu1 }
  0xe5   : > { %v576_v13 = vadd.f32 %v1702_v10, %v575_v12  ;;  %v1798_v14 = vpop.f32.mrb[1].mxu0  ;;  %v628_v16 = vadd.f32 %v1703_v11, %v627_v15  ;;  %v1806_v18 = vpop.f32.mrb[1].mxu1 }
  0xe6   : > { %v578_v17 = vpop.f32.mrb[2].mxu0  ;;  %v630_v21 = vpop.f32.mrb[2].mxu1 }
  0xe7   : > { %v2133_v19 = vpack.c.bf16 %v576_v13, %v576_v13  ;;  %v1799_v20 = vpop.f32.mrb[3].mxu0  ;;  %v1807_v22 = vpop.f32.mrb[3].mxu1  ;;  %v2135_v23 = vpack.c.bf16 %v628_v16, %v628_v16 }
  0xe9   : > { %748 = vrot.lane.b32.xlu0 %v2133_v19, %s1977_s26 }
  0xec   : > { %v679_v26 = vpop.f32.mrb[4].mxu0  ;;  %v731_v28 = vpop.f32.mrb[4].mxu1 }
  0xed   : > { %v680_v27 = vadd.f32 %v1704_v24, %v679_v26  ;;  %798 = vrot.lane.b32.xlu0 %v2135_v23, %s1977_s26  ;;  %v1814_v29 = vpop.f32.mrb[5].mxu0  ;;  %v732_v30 = vadd.f32 %v1705_v25, %v731_v28  ;;  %v1822_v32 = vpop.f32.mrb[5].mxu1 }
  0xee   : > { %v682_v31 = vpop.f32.mrb[6].mxu0  ;;  %v734_v35 = vpop.f32.mrb[6].mxu1 }
  0xef   : > { %v2145_v33 = vpack.c.bf16 %v680_v27, %v680_v27  ;;  %v1815_v34 = vpop.f32.mrb[7].mxu0  ;;  %v1823_v36 = vpop.f32.mrb[7].mxu1  ;;  %v2147_v37 = vpack.c.bf16 %v732_v30, %v732_v30 }
  0xf1   : > { %847 = vrot.lane.b32.xlu1 %v2145_v33, %s1977_s26 }
  0xf5   : > { %896 = vrot.lane.b32.xlu1 %v2147_v37, %s1977_s26 }
 0x15b   : > { %v749_v38 = vpop.permute.xlu0 %748 }
 0x15c   : > { %v755_v39 = vsel %vm750_vm2, %v749_v38, 0 }
 0x15d   : > { %1825 = vmatpush3.bf16.xpose.msra.mxu0 %v755_v39 }
 0x15e   : > { %1836 = vmatprep.subr.bf16.mxu0 %v1975_v1 }
 0x15f   : > { %v799_v40 = vpop.permute.xlu0 %798 }
 0x160   : > { %v804_v41 = vsel %vm750_vm2, %v799_v40, 0 }
 0x161   : > { %1831 = vmatpush3.bf16.xpose.msra.mxu1 %v804_v41 }
 0x162   : > { %1842 = vmatprep.subr.bf16.mxu1 %v1975_v1 }
 0x163   : > { %v848_v42 = vpop.permute.xlu1 %847 }
 0x164   : > { %v853_v43 = vsel %vm750_vm2, %v848_v42, 0  ;;  %1827 = vmatmul.mubr.msk.bf16.vlgmr.msra.gmra.mrb[8].mxu0 %vm750_vm2, %v2133_v19 }
 0x165   : > { %1837 = vmatpush3.bf16.xpose.msra.mxu0 %v853_v43  ;;  %1838 = vmatprep.mubr.msk.bf16.mxu0 %vm1976_vm0, %v1975_v1 }
 0x166   : > { %1848 = vmatprep.subr.bf16.mxu0 %v1975_v1 }
 0x167   : > { %v897_v44 = vpop.permute.xlu1 %896 }
 0x168   : > { %v902_v45 = vsel %vm750_vm2, %v897_v44, 0  ;;  %1833 = vmatmul.mubr.msk.bf16.vlgmr.msra.gmra.mrb[8].mxu1 %vm750_vm2, %v2135_v23 }
 0x169   : > { %1843 = vmatpush3.bf16.xpose.msra.mxu1 %v902_v45  ;;  %1844 = vmatprep.mubr.msk.bf16.mxu1 %vm1976_vm0, %v1975_v1 }
 0x16a   : > { %1854 = vmatprep.subr.bf16.mxu1 %v1975_v1 }
 0x16c   : > { %1839 = vmatmul.mubr.msk.bf16.vlgmr.msra.gmra.mrb[12].mxu0 %vm750_vm2, %v2145_v33 }
 0x16d   : > { %1850 = vmatprep.mubr.msk.bf16.mxu0 %vm1976_vm0, %v1975_v1 }
 0x170   : > { %1845 = vmatmul.mubr.msk.bf16.vlgmr.msra.gmra.mrb[12].mxu1 %vm750_vm2, %v2147_v37 }
 0x171   : > { %1856 = vmatprep.mubr.msk.bf16.mxu1 %vm1976_vm0, %v1975_v1 }
 0x237   : > { %v791_v47 = vpop.f32.mrb[8].mxu0 }
 0x238   : > { %v792_v48 = vadd.f32 %v1718_v46, %v791_v47  ;;  %v1828_v49 = vpop.f32.mrb[9].mxu0 }
 0x239   : > { %v794_v50 = vpop.f32.mrb[10].mxu0 }
 0x23a   : > { %v1829_v51 = vpop.f32.mrb[11].mxu0  ;;  %v944_v52 = vsel %vm750_vm2, %v792_v48, -inf }
 0x23b   : > { %v840_v53 = vpop.f32.mrb[8].mxu1  ;;  %945 = vmax.xlane.f32.xlu0 %v944_v52 }
 0x23c   : > { %v841_v54 = vadd.f32 %v1718_v46, %v840_v53  ;;  %v1834_v55 = vpop.f32.mrb[9].mxu1  ;;  %v1189_v53 = vld [vmem:[%s2312_s4] sm:$0xf] }
 0x23d   : > { %v843_v56 = vpop.f32.mrb[10].mxu1  ;;  %v1190_v55 = vld [vmem:[%s2312_s4 + $0x4] sm:$0xf] }
 0x23e   : > { %v1835_v57 = vpop.f32.mrb[11].mxu1  ;;  %v947_v58 = vsel %vm750_vm2, %v841_v54, -inf  ;;  %v1243_v56 = vsel %vm997_vm3, %v1190_v55, 0 }
 0x23f   : > { %948 = vmax.xlane.f32.xlu1 %v947_v58  ;;  %v889_v59 = vpop.f32.mrb[12].mxu0  ;;  %v1191_v57 = vld [vmem:[%s2312_s4 + $0x8] sm:$0xf] }
 0x240   : > { %v890_v60 = vadd.f32 %v1718_v46, %v889_v59  ;;  %v1840_v61 = vpop.f32.mrb[13].mxu0 }
 0x241   : > { %v892_v62 = vpop.f32.mrb[14].mxu0  ;;  %v1289_v61 = vsel %vm997_vm3, %v1191_v57, 0  ;;  %v1732_v57 = vld [vmem:[%s2314_s6] ss:$0 sm:$0xff] }
 0x242   : > { %v1841_v63 = vpop.f32.mrb[15].mxu0  ;;  %v950_v0 = vsel %vm750_vm2, %v890_v60, -inf }
 0x243   : > { %v938_v2 = vpop.f32.mrb[12].mxu1  ;;  %951 = vmax.xlane.f32.xlu0 %v950_v0  ;;  %v1192_v0 = vld [vmem:[%s2312_s4 + $0xc] sm:$0xf] }
 0x244   : > { %v939_v3 = vadd.f32 %v1718_v46, %v938_v2  ;;  %v1846_v4 = vpop.f32.mrb[13].mxu1 }
 0x245   : > { %v941_v5 = vpop.f32.mrb[14].mxu1 }
 0x246   : > { %v1847_v6 = vpop.f32.mrb[15].mxu1  ;;  %v953_v8 = vsel %vm750_vm2, %v939_v3, -inf  ;;  %v1335_v5 = vsel %vm997_vm3, %v1192_v0, 0  ;;  %v1940_v0 = vld [vmem:[%s2318_s10 + $0x8] sm:$0xff]  }
 0x247   : > { %954 = vmax.xlane.f32.xlu0 %v953_v8 }
 0x250   : > { %992 = vrot.lane.b32.xlu1 %v2133_v19, %s1978_s20 }
 0x2c8   : > { %v946_v9 = vpop.xlane.xlu0 %945 }
 0x2c9   : > { %v956_v10 = vsub.f32 %v792_v48, %v946_v9 }
 0x2cb   : > { %v960_v11 = vmul.f32 1.442695, %v956_v10 }
 0x2cc   : > { %v949_v12 = vpop.xlane.xlu1 %948 }
 0x2cd   : > { %1943 = vpow2.f32 %v960_v11  ;;  %v957_v13 = vsub.f32 %v841_v54, %v949_v12  ;;  %v1197_v54 = vsel %vm997_vm3, %v1189_v53, 0 }
 0x2cf   : > { %v962_v14 = vmul.f32 1.442695, %v957_v13 }
 0x2d0   : > { %v993_v15 = vpop.permute.xlu1 %992  ;;  %v952_v16 = vpop.xlane.xlu0 %951 }
 0x2d1   : > { %1945 = vpow2.f32 %v962_v14  ;;  %v999_v17 = vsel %vm997_vm3, %v993_v15, 0  ;;  %v958_v18 = vsub.f32 %v890_v60, %v952_v16 }
 0x2d2   : > { %1849 = vmatpush3.bf16.msra.mxu0 %v999_v17 }
 0x2d3   : > { %v964_v20 = vmul.f32 1.442695, %v958_v18  ;;  %1860 = vmatprep.subr.bf16.mxu0 %v1975_v1 }
 0x2d4   : > { %v955_v21 = vpop.xlane.xlu0 %954 }
 0x2d5   : > { %1947 = vpow2.f32 %v964_v20  ;;  %v959_v19 = vsub.f32 %v939_v3, %v955_v21 }
 0x2d7   : > { %v1944_v22 = vpop.eup %1943  ;;  %v966_v24 = vmul.f32 1.442695, %v959_v19 }
 0x2d8   : > { %v968_v25 = vsel %vm750_vm2, %v1944_v22, 0.0 }
 0x2d9   : > { %1949 = vpow2.f32 %v966_v24  ;;  %969 = vadd.xlane.f32.xlu1 %v968_v25 }
 0x2db   : > { %v1946_v26 = vpop.eup %1945 }
 0x2dc   : > { %v971_v27 = vsel %vm750_vm2, %v1946_v26, 0.0 }
 0x2dd   : > { %972 = vadd.xlane.f32.xlu0 %v971_v27 }
 0x2df   : > { %v1948_v28 = vpop.eup %1947 }
 0x2e0   : > { %v974_v29 = vsel %vm750_vm2, %v1948_v28, 0.0 }
 0x2e1   : > { %975 = vadd.xlane.f32.xlu1 %v974_v29 }
 0x2e3   : > { %v1950_v30 = vpop.eup %1949 }
 0x2e4   : > { %v977_v31 = vsel %vm750_vm2, %v1950_v30, 0.0 }
 0x2e5   : > { %978 = vadd.xlane.f32.xlu0 %v977_v31 }
 0x2f2   : > { %1089 = vrot.lane.b32.xlu1 %v2145_v33, %s1978_s20 }
 0x2f6   : > { %1137 = vrot.lane.b32.xlu1 %v2147_v37, %s1978_s20 }
 0x2fb   : > { %1041 = vrot.lane.b32.xlu0 %v2135_v23, %s1978_s20 }
 0x366   : > { %v970_v32 = vpop.xlane.xlu1 %969 }
 0x367   : > { %1951 = vrcp.f32 %v970_v32 }
 0x36a   : > { %v973_v34 = vpop.xlane.xlu0 %972 }
 0x36b   : > { %1953 = vrcp.f32 %v973_v34 }
 0x36e   : > { %v976_v35 = vpop.xlane.xlu1 %975 }
 0x36f   : > { %1955 = vrcp.f32 %v976_v35 }
 0x371   : > { %v1952_v36 = vpop.eup %1951 }
 0x372   : > { %v984_v38 = vmul.f32 %v1952_v36, %v1944_v22  ;;  %v1090_v39 = vpop.permute.xlu1 %1089  ;;  %v979_v40 = vpop.xlane.xlu0 %978 }
 0x373   : > { %1957 = vrcp.f32 %v979_v40  ;;  %v1095_v43 = vsel %vm997_vm3, %v1090_v39, 0 }
 0x374   : > { %v988_v41 = vpack.c.bf16 %v984_v38, %v984_v38 }
 0x375   : > { %v1954_v42 = vpop.eup %1953 }
 0x376   : > { %v985_v33 = vmul.f32 %v1954_v42, %v1946_v26  ;;  %1851 = vmatmul.mubr.msk.bf16.vlgmr.msra.gmra.mrb[16].mxu0 %vm750_vm2, %v988_v41  ;;  %v1042_v37 = vpop.permute.xlu0 %1041  ;;  %v1138_v44 = vpop.permute.xlu1 %1137  ;;  %v1731_v41 = vld [vmem:[%s2313_s5] ss:$0 sm:$0xff] }
 0x377   : > { %1861 = vmatpush3.bf16.msra.mxu0 %v1095_v43  ;;  %v1047_v23 = vsel %vm997_vm3, %v1042_v37, 0  ;;  %1862 = vmatprep.mubr.msk.bf16.mxu0 %vm1976_vm0, %v1975_v1  ;;  %v1143_v48 = vsel %vm997_vm3, %v1138_v44, 0  ;;  %v479_v37 = vunpack.c.l.bf16 %v2098_v7  ;;  %v1938_v7 = vld [vmem:[%s2316_s8 + $0x8] sm:$0xff]  }
 0x378   : > { %1855 = vmatpush3.bf16.msra.mxu1 %v1047_v23  ;;  %v989_v45 = vpack.c.bf16 %v985_v33, %v985_v33  ;;  %1872 = vmatprep.subr.bf16.mxu0 %v1975_v1 }
 0x379   : > { %v1956_v46 = vpop.eup %1955  ;;  %1866 = vmatprep.subr.bf16.mxu1 %v1975_v1 }
 0x37a   : > { %v986_v47 = vmul.f32 %v1956_v46, %v1948_v28 }
 0x37b   : > { %1857 = vmatmul.mubr.msk.bf16.vlgmr.msra.gmra.mrb[16].mxu1 %vm750_vm2, %v989_v45 }
 0x37c   : > { %1867 = vmatpush3.bf16.msra.mxu1 %v1143_v48  ;;  %v990_v49 = vpack.c.bf16 %v986_v47, %v986_v47  ;;  %1868 = vmatprep.mubr.msk.bf16.mxu1 %vm1976_vm0, %v1975_v1 }
 0x37d   : > { %v1958_v50 = vpop.eup %1957  ;;  %1878 = vmatprep.subr.bf16.mxu1 %v1975_v1 }
 0x37e   : > { %v987_v51 = vmul.f32 %v1958_v50, %v1950_v30  ;;  %1863 = vmatmul.mubr.msk.bf16.vlgmr.msra.gmra.mrb[20].mxu0 %vm750_vm2, %v990_v49 }
 0x37f   : > { %1874 = vmatprep.mubr.msk.bf16.mxu0 %vm1976_vm0, %v1975_v1  ;;  %1873 = vmatpush3.bf16.msra.mxu0 %v1197_v54 }
 0x380   : > { %v991_v52 = vpack.c.bf16 %v987_v51, %v987_v51  ;;  %1884 = vmatprep.subr.bf16.mxu0 %v1975_v1 }
 0x383   : > { %1869 = vmatmul.mubr.msk.bf16.vlgmr.msra.gmra.mrb[20].mxu1 %vm750_vm2, %v991_v52  ;;  %v1937_v52 = vld [vmem:[%s2316_s8] sm:$0xff]  }
 0x384   : > { %1880 = vmatprep.mubr.msk.bf16.mxu1 %vm1976_vm0, %v1975_v1  ;;  %1879 = vmatpush3.bf16.msra.mxu1 %v1243_v56 }
 0x385   : > { %1890 = vmatprep.subr.bf16.mxu1 %v1975_v1 }
 0x449   : > { %v1035_v58 = vpop.f32.mrb[16].mxu0 }
 0x44a   : > { %v1185_v59 = vpack.c.bf16 %v1035_v58, %v1035_v58  ;;  %v1852_v60 = vpop.f32.mrb[17].mxu0 }
 0x44b   : > { %v1038_v62 = vpop.f32.mrb[18].mxu0 }
 0x44c   : > { %v1853_v63 = vpop.f32.mrb[19].mxu0  ;;  %1875 = vmatmul.mubr.msk.bf16.vlgmr.msra.gmra.mrb[24].mxu0 %vm750_vm2, %v1185_v59  ;;  %v1733_v59 = vld [vmem:[%s2315_s7] ss:$0 sm:$0xff] }
 0x44d   : > { %1885 = vmatpush3.bf16.msra.mxu0 %v1289_v61  ;;  %1886 = vmatprep.mubr.msk.bf16.mxu0 %vm1976_vm0, %v1975_v1  ;;  %v1939_v63 = vld [vmem:[%s2318_s10] sm:$0xff]  }
 0x44e   : > { %v1083_v2 = vpop.f32.mrb[16].mxu1  ;;  %1896 = vmatprep.subr.bf16.mxu0 %v1975_v1 }
 0x44f   : > { %v1186_v3 = vpack.c.bf16 %v1083_v2, %v1083_v2  ;;  %v1858_v4 = vpop.f32.mrb[17].mxu1  ;;  %v1941_v2 = vld [vmem:[%s2318_s10 + $0x10] sm:$0xff]  }
 0x450   : > { %v1086_v6 = vpop.f32.mrb[18].mxu1  ;;  %v1734_v4 = vld [vmem:[%s2317_s9] ss:$0 sm:$0xff] }
 0x451   : > { %v1859_v8 = vpop.f32.mrb[19].mxu1  ;;  %v1131_v9 = vpop.f32.mrb[20].mxu0  ;;  %1881 = vmatmul.mubr.msk.bf16.vlgmr.msra.gmra.mrb[24].mxu1 %vm750_vm2, %v1186_v3  ;;  %v1942_v3 = vld [vmem:[%s2318_s10 + $0x18] sm:$0xff]  }
 0x452   : > { %v1187_v10 = vpack.c.bf16 %v1131_v9, %v1131_v9  ;;  %v1864_v11 = vpop.f32.mrb[21].mxu0  ;;  %1891 = vmatpush3.bf16.msra.mxu1 %v1335_v5  ;;  %1892 = vmatprep.mubr.msk.bf16.mxu1 %vm1976_vm0, %v1975_v1 }
 0x453   : > { %v1134_v12 = vpop.f32.mrb[22].mxu0  ;;  %1904 = vmatprep.subr.bf16.mxu1 %v1975_v1 }
 0x454   : > { %v1865_v13 = vpop.f32.mrb[23].mxu0  ;;  %1887 = vmatmul.mubr.msk.bf16.vlgmr.msra.gmra.mrb[28].mxu0 %vm750_vm2, %v1187_v10 }
 0x455   : > { %1900 = vmatprep.mubr.msk.bf16.mxu0 %vm1976_vm0, %v1975_v1  ;;  %1897 = vmatpush3.bf16.msra.mxu0 %v1937_v52 }
 0x456   : > { %v1179_v14 = vpop.f32.mrb[20].mxu1  ;;  %1898 = vmatprep.subr.bf16.mxu0 %v1975_v1 }
 0x457   : > { %v1188_v15 = vpack.c.bf16 %v1179_v14, %v1179_v14  ;;  %v1870_v16 = vpop.f32.mrb[21].mxu1 }
 0x458   : > { %v1182_v17 = vpop.f32.mrb[22].mxu1 }
 0x459   : > { %v1871_v18 = vpop.f32.mrb[23].mxu1  ;;  %1893 = vmatmul.mubr.msk.bf16.vlgmr.msra.gmra.mrb[28].mxu1 %vm750_vm2, %v1188_v15  ;;  %1899 = vmatpush3.bf16.msra.mxu0 %v1938_v7 }
 0x45a   : > { %1912 = vmatprep.mubr.msk.bf16.mxu1 %vm1976_vm0, %v1975_v1  ;;  %1905 = vmatpush3.bf16.msra.mxu1 %v1939_v63 }
 0x45b   : > { %1906 = vmatprep.subr.bf16.mxu1 %v1975_v1 }
 0x45e   : > { %1907 = vmatpush3.bf16.msra.mxu1 %v1940_v0 }
 0x45f   : > { %1908 = vmatprep.subr.bf16.mxu1 %v1975_v1 }
 0x462   : > { %1909 = vmatpush3.bf16.msra.mxu1 %v1941_v2 }
 0x463   : > { %1910 = vmatprep.subr.bf16.mxu1 %v1975_v1 }
 0x466   : > { %1911 = vmatpush3.bf16.msra.mxu1 %v1942_v3 }
 0x51f   : > { %v1233_v20 = vpop.f32.mrb[24].mxu0 }
 0x520   : > { %v1876_v21 = vpop.f32.mrb[25].mxu0  ;;  %v1377_v25 = vsel %vm537_vm1, %v1233_v20, 0.0 }
 0x521   : > { %v1236_v19 = vpop.f32.mrb[26].mxu0 }
 0x522   : > { %v1877_v22 = vpop.f32.mrb[27].mxu0 }
 0x524   : > { %v1279_v24 = vpop.f32.mrb[24].mxu1 }
 0x525   : > { %v1378_v26 = vsel %vm537_vm1, %v1279_v24, 0.0  ;;  %v1882_v27 = vpop.f32.mrb[25].mxu1 }
 0x526   : > { %v1379_v28 = vadd.f32 %v1378_v26, %v1377_v25  ;;  %v1282_v29 = vpop.f32.mrb[26].mxu1 }
 0x527   : > { %v1883_v30 = vpop.f32.mrb[27].mxu1  ;;  %v1325_v31 = vpop.f32.mrb[28].mxu0 }
 0x528   : > { %v1380_v32 = vsel %vm537_vm1, %v1325_v31, 0.0  ;;  %v1888_v34 = vpop.f32.mrb[29].mxu0  ;;  %v1979_v31 = vmov -1.0  }
 0x529   : > { %v1381_v35 = vadd.f32 %v1380_v32, %v1379_v28  ;;  %v1328_v36 = vpop.f32.mrb[30].mxu0 }
 0x52a   : > { %v1889_v38 = vpop.f32.mrb[31].mxu0 }
 0x52c   : > { %v1371_v39 = vpop.f32.mrb[28].mxu1 }
 0x52d   : > { %v1382_v40 = vsel %vm537_vm1, %v1371_v39, 0.0  ;;  %v1894_v42 = vpop.f32.mrb[29].mxu1 }
 0x52e   : > { %v1383_v33 = vadd.f32 %v1382_v40, %v1381_v35  ;;  %v1374_v43 = vpop.f32.mrb[30].mxu1  ;;  %v1738_v40 = vld [vmem:[%s2319_s11] ss:$0 sm:$0xff] }
 0x52f   : > { %v1895_v23 = vpop.f32.mrb[31].mxu1 }
 0x530   : > { %v1391_v44 = vadd.f32 %v1731_v41, %v1383_v33 }
 0x532   : > { %v1392_v45 = vadd.f32 %v1391_v44, %v479_v37 }
 0x534   : > { %v1395_v46 = vsel %vm537_vm1, %v1392_v45, 0.0 }
 0x535   : > { %1396 = vadd.xlane.f32.xlu0 %v1395_v46 }
 0x5c2   : > { %v1397_v47 = vpop.xlane.xlu0 %1396 }
 0x5c3   : > { %v1399_v48 = vmul.f32 0.03125, %v1397_v47 }
 0x5c5   : > { %v1400_v49 = vsub.f32 %v1392_v45, %v1399_v48 }
 0x5c7   : > { %v1401_v50 = vmul.f32 %v1400_v49, %v1400_v49 }
 0x5c9   : > { %v1402_v51 = vsel %vm537_vm1, %v1401_v50, 0.0 }
 0x5ca   : > { %1403 = vadd.xlane.f32.xlu1 %v1402_v51 }
 0x657   : > { %v1404_v53 = vpop.xlane.xlu1 %1403 }
 0x658   : > { %v1405_v54 = vmul.f32 0.03125, %v1404_v53  ;;  %v1744_v53 = vld [vmem:[%s2320_s12] ss:$0 sm:$0xff] }
 0x65a   : > { %v1406_v55 = vadd.f32 1e-12, %v1405_v54 }
 0x65c   : > { %1959 = vrsqrt.f32 %v1406_v55  ;;  %v1745_v55 = vld [vmem:[%s2321_s13] ss:$0 sm:$0xff] }
 0x666   : > { %v1960_v56 = vpop.eup %1959 }
 0x667   : > { %v1408_v58 = vmul.f32 %v1960_v56, %v1400_v49 }
 0x669   : > { %v1415_v60 = vmul.f32 %v1732_v57, %v1408_v58 }
 0x66b   : > { %v1422_v61 = vadd.f32 %v1733_v59, %v1415_v60 }
 0x66d   : > { %v1428_v62 = vpack.c.bf16 %v1422_v61, %v1422_v61 }
 0x66f   : > { %1901 = vmatmul.mubr.msk.bf16.vlgmr.msra.gmra.mrb[32].mxu0 %vm537_vm1, %v1428_v62 }
 0x742   : > { %v1484_v5 = vpop.f32.mrb[32].mxu0 }
 0x743   : > { %v1485_v6 = vadd.f32 %v1734_v4, %v1484_v5  ;;  %v1902_v8 = vpop.f32.mrb[33].mxu0 }
 0x744   : > { %v1487_v9 = vpop.f32.mrb[34].mxu0 }
 0x745   : > { %v1491_v10 = vmul.f32 0.70710677, %v1485_v6  ;;  %v1903_v11 = vpop.f32.mrb[35].mxu0  ;;  %v1490_v35 = vmul.f32 0.5, %v1485_v6 }
 0x747   : > { %v1494_v12 = vand.u32 2147483647, %v1491_v10  ;;  %vm1492_vm4 = vcmp.ge.f32.partialorder %v1491_v10, 0.0 }
 0x748   : > { %v1493_v32 = vsel %vm1492_vm4, 1.0, %v1979_v31 }
 0x749   : > { %v1495_v13 = vmul.f32 0.3275911, %v1494_v12  ;;  %v1507_v1 = vsub.f32 0.0, %v1494_v12 }
 0x74b   : > { %v1496_v14 = vadd.f32 1.0, %v1495_v13  ;;  %v1508_v16 = vmul.f32 %v1507_v1, %v1494_v12 }
 0x74d   : > { %1961 = vrcp.f32 %v1496_v14  ;;  %v1509_v20 = vmul.f32 1.442695, %v1508_v16 }
 0x74f   : > { %1963 = vpow2.f32 %v1509_v20 }
 0x757   : > { %v1962_v15 = vpop.eup %1961 }
 0x758   : > { %v1498_v17 = vmul.f32 1.0614054, %v1962_v15 }
 0x759   : > { %v1964_v28 = vpop.eup %1963 }
 0x75a   : > { %v1499_v18 = vadd.f32 -1.4531521, %v1498_v17 }
 0x75c   : > { %v1500_v21 = vmul.f32 %v1962_v15, %v1499_v18 }
 0x75e   : > { %v1501_v19 = vadd.f32 1.4214138, %v1500_v21 }
 0x760   : > { %v1502_v22 = vmul.f32 %v1962_v15, %v1501_v19 }
 0x762   : > { %v1503_v24 = vadd.f32 -0.28449672, %v1502_v22 }
 0x764   : > { %v1504_v25 = vmul.f32 %v1962_v15, %v1503_v24 }
 0x766   : > { %v1505_v26 = vadd.f32 0.2548296, %v1504_v25 }
 0x768   : > { %v1506_v27 = vmul.f32 %v1962_v15, %v1505_v26 }
 0x76a   : > { %v1511_v29 = vmul.f32 %v1964_v28, %v1506_v27 }
 0x76c   : > { %v1512_v30 = vsub.f32 1.0, %v1511_v29 }
 0x76e   : > { %v1513_v34 = vmul.f32 %v1512_v30, %v1493_v32 }
 0x770   : > { %v1514_v36 = vadd.f32 1.0, %v1513_v34 }
 0x772   : > { %v1515_v38 = vmul.f32 %v1514_v36, %v1490_v35 }
 0x774   : > { %v1525_v39 = vpack.c.bf16 %v1515_v38, %v1515_v38 }
 0x776   : > { %1913 = vmatmul.mubr.msk.bf16.vlgmr.msra.gmra.mrb[32].mxu1 %vm1556_vm5, %v1525_v39 }
 0x849   : > { %v1594_v41 = vpop.f32.mrb[32].mxu1 }
 0x84a   : > { %v1595_v42 = vadd.f32 %v1738_v40, %v1594_v41  ;;  %v1914_v33 = vpop.f32.mrb[33].mxu1 }
 0x84b   : > { %v1597_v43 = vpop.f32.mrb[34].mxu1 }
 0x84c   : > { %v1915_v37 = vpop.f32.mrb[35].mxu1  ;;  %v1600_v23 = vadd.f32 %v1595_v42, %v1422_v61 }
 0x84e   : > { %v1603_v44 = vsel %vm537_vm1, %v1600_v23, 0.0 }
 0x84f   : > { %1604 = vadd.xlane.f32.xlu0 %v1603_v44 }
 0x8dc   : > { %v1605_v45 = vpop.xlane.xlu0 %1604 }
 0x8dd   : > { %v1606_v46 = vmul.f32 0.03125, %v1605_v45 }
 0x8df   : > { %v1607_v47 = vsub.f32 %v1600_v23, %v1606_v46 }
 0x8e1   : > { %v1608_v48 = vmul.f32 %v1607_v47, %v1607_v47 }
 0x8e3   : > { %v1609_v49 = vsel %vm537_vm1, %v1608_v48, 0.0 }
 0x8e4   : > { %1610 = vadd.xlane.f32.xlu0 %v1609_v49 }
 0x971   : > { %v1611_v50 = vpop.xlane.xlu0 %1610 }
 0x972   : > { %v1612_v51 = vmul.f32 0.03125, %v1611_v50 }
 0x974   : > { %v1613_v52 = vadd.f32 1e-12, %v1612_v51 }
 0x976   : > { %1965 = vrsqrt.f32 %v1613_v52 }
 0x980   : > { %v1966_v7 = vpop.eup %1965 }
 0x981   : > { %v1615_v54 = vmul.f32 %v1966_v7, %v1607_v47 }
 0x983   : > { %v1622_v56 = vmul.f32 %v1744_v53, %v1615_v54 }
 0x985   : > { %v1629_v57 = vadd.f32 %v1745_v55, %v1622_v56 }
 0x987   : > { %v1630_v58 = vpack.c.bf16 %v1629_v57, %v1629_v57 }
 0x989   : > { %1632 = vst.msk [vmem:[%s476_s18] sm:$0xf] %vm1631_vm6, %v1630_v58 }
 0x98a PF: > { %s24_s29 = sadd.s32 1, %s1973_s29  }
 0x98b   : > { %p21_p4 = scmp.ge.s32.totalorder %s24_s29, 4  }
 0x98d   :  { %23 = sbr.rel (!%p21_p4) target bundleno = 1 (0x1), region = 109 }

</bundles_post_ra>
